<compile_context>
chip_gen: v7x
topology: tpu7x:2x2x1
jax: 0.10.0
libtpu: 0.0.40
codegen_flags: <defaults>
</compile_context>

<pallas_src>
from functools import partial

import numpy as np
import jax
import jax.numpy as jnp
from jax.experimental import pallas as pl
from jax.experimental.pallas import tpu as pltpu

# Perception filters, same values / stacking order as the module __init__:
# torch.stack([ident, sobel_x, sobel_x.T, lap])
IDENT  = np.array([[0., 0., 0.], [0., 1., 0.], [0., 0., 0.]], np.float32)
SOBELX = np.array([[-1., 0., 1.], [-2., 0., 2.], [-1., 0., 1.]], np.float32)
SOBELY = np.ascontiguousarray(SOBELX.T)
LAP    = np.array([[1., 2., 1.], [2., -12., 2.], [1., 2., 1.]], np.float32)
FILTERS = np.stack([IDENT, SOBELX, SOBELY, LAP], axis=0)          # (4, 3, 3)


def _lane_roll(v, shift):
    """Circular roll along the last (lane) axis with a static shift (XLU)."""
    n = v.shape[-1]
    s = shift % n
    if s == 0:
        return v
    return pltpu.roll(v, s, axis=v.ndim - 1)


def _recursive_nn_kernel(x_ref, m0_ref, mw_ref, weff_ref, b1_ref, w2_ref,
                         o_ref, xp_ref, *, width):
    # x_ref   : (Bt, C, HW)   batch tile, NCHW with H*W flattened on lanes
    # m0_ref  : (1, HW)       f32 mask, 1.0 where column index == 0
    # mw_ref  : (1, HW)       f32 mask, 1.0 where column index == W-1
    # weff_ref: (9, HID, Cp)  per-tap cn1 weights (slab j = b*3 + a), c padded
    # b1_ref  : (HID, 1)      cn1 bias
    # w2_ref  : (C, HID)      cn2 weight
    # o_ref   : (Bt, C, HW)
    # xp_ref  : (Bt, Cp, HW)  persistent VMEM scratch (channel-padded x)
    W = width
    Bt, C, HW = x_ref.shape
    Cp = xp_ref.shape[1]

    # In-kernel channel pad (no wrapper HBM pass). Pad rows are re-zeroed
    # every step (cheap, ~1 vreg/image) so this is safe under megacore grid
    # splitting; their weight columns are zero as well.
    if Cp > C:
        xp_ref[:, C:, :] = jnp.zeros((Bt, Cp - C, HW), jnp.float32)
    xp_ref[:, :C, :] = x_ref[...]

    # Precomputed W-boundary masks (loop-invariant, resident across the grid).
    on_col0 = jnp.broadcast_to(m0_ref[...], (Cp, HW)) != 0.0   # w == 0
    on_colw = jnp.broadcast_to(mw_ref[...], (Cp, HW)) != 0.0   # w == W-1

    for lb in range(Bt):
        x = xp_ref[lb]                                          # (Cp, HW) f32

        # --- W-direction circular shifts FIRST (on Cp rows, not 3*Cp) ------
        # Flattened index p = h*W + w; a plain lane roll wraps across row
        # boundaries, so the single boundary column is fixed with a select.
        # dw=+1 (filter col b=0): column 0 must read column W-1 of SAME row.
        xw0 = jnp.where(on_col0, _lane_roll(x, 1 - W), _lane_roll(x, 1))
        # dw=-1 (filter col b=2): column W-1 must read column 0 of SAME row.
        xw2 = jnp.where(on_colw, _lane_roll(x, W - 1), _lane_roll(x, -1))
        xw = (xw0, x, xw2)                                      # b = 0, 1, 2

        # --- perception conv + cn1 as 9 accumulating (HID,Cp)x(Cp,HW) dots -
        # Split-K: no (9*Cp, HW) buffer is ever concatenated/materialized.
        # H-direction circular shift is an exact lane roll by +-W.
        acc = None
        for b_idx in range(3):
            xb = xw[b_idx]
            ys = (_lane_roll(xb, W), xb, _lane_roll(xb, -W))    # a = 0, 1, 2
            for a_idx in range(3):
                part = jnp.dot(weff_ref[b_idx * 3 + a_idx], ys[a_idx],
                               preferred_element_type=jnp.float32)
                acc = part if acc is None else acc + part

        # relu / cn2 / residual.
        h = jnp.maximum(acc + b1_ref[...], 0.0)                 # (HID, HW)
        out = jnp.dot(w2_ref[...], h,
                      preferred_element_type=jnp.float32)       # (C, HW)
        o_ref[lb] = out + x_ref[lb]


def prepare_recursive_nn_params(w1, b1, w2, *, n_chan, height, width):
    """Fold the 3x3 perception stencil into cn1 and build boundary masks.

    Hoist this out of any recursive-application loop (weights are static).
    w1 : (96, 4*C) == cn1.weight[:, :, 0, 0]  (input index = c*4 + f)
    b1 : (96,)     == cn1.bias
    w2 : (C, 96)   == cn2.weight[:, :, 0, 0]
    """
    C, H, W = n_chan, height, width
    hid = w1.shape[0]
    HW = H * W
    Cp = -(-C // 8) * 8                       # sublane-aligned channels (12->16)

    filt = jnp.asarray(FILTERS)                                  # (4,3,3) [f,a,b]
    w1_g = jnp.asarray(w1, jnp.float32).reshape(hid, C, 4)       # [o, c, f]
    weff = jnp.einsum('ocf,fab->baoc', w1_g, filt)               # (3:b, 3:a, hid, C)
    weff = jnp.pad(weff, ((0, 0), (0, 0), (0, 0), (0, Cp - C)))  # pad c -> Cp (zeros)
    weff = weff.reshape(9, hid, Cp)                              # slab j = b*3 + a

    b1_k = jnp.asarray(b1, jnp.float32).reshape(hid, 1)
    w2_k = jnp.asarray(w2, jnp.float32)                          # (C, hid)

    col = jnp.arange(HW, dtype=jnp.int32) % W
    m_col0 = (col == 0).astype(jnp.float32).reshape(1, HW)
    m_colw = (col == W - 1).astype(jnp.float32).reshape(1, HW)
    return {"weff": weff, "b1": b1_k, "w2": w2_k,
            "m_col0": m_col0, "m_colw": m_colw}


def _pick_batch_tile(B):
    """Largest divisor of B that keeps >= 2 grid steps (2 TCs on v7x)."""
    if B <= 1:
        return 1
    best = 1
    for d in range(1, B // 2 + 1):
        if B % d == 0:
            best = d
    return best


def recursive_nn_forward(x_nchw, w1, b1, w2, *, params=None, batch_tile=None):
    """Forward pass matching RecursiveNN.forward.

    x_nchw : (B, C, H, W) float32  -- same NCHW convention as PyTorch
    returns (B, C, H, W) float32
    """
    B, C, H, W = x_nchw.shape
    hid = w1.shape[0]
    HW = H * W
    Cp = -(-C // 8) * 8

    if params is None:
        params = prepare_recursive_nn_params(w1, b1, w2,
                                             n_chan=C, height=H, width=W)
    if batch_tile is None:
        batch_tile = _pick_batch_tile(B)
    assert B % batch_tile == 0, "batch_tile must divide the batch size"

    x_flat = x_nchw.reshape(B, C, HW).astype(jnp.float32)   # no channel pad

    # Explicit VMEM budget (matters for v5e's 16 MiB default scoped limit and
    # for v7x's 64 MiB physical VMEM at larger H*W).
    est_bytes = 4 * (
        2 * 2 * batch_tile * C * HW                      # x / out blocks, dbl-buffered
        + 2 * (9 * hid * Cp + hid + C * hid + 2 * HW)    # resident weights & masks
        + batch_tile * Cp * HW                           # padded-activation scratch
        + 16 * Cp * HW + 3 * hid * HW)                   # shift / acc / h intermediates
    vmem_limit = int(min(64 * 1024 * 1024, max(32 * 1024 * 1024, 2 * est_bytes)))

    out = pl.pallas_call(
        partial(_recursive_nn_kernel, width=W),
        out_shape=jax.ShapeDtypeStruct((B, C, HW), jnp.float32),
        grid_spec=pltpu.PrefetchScalarGridSpec(
            num_scalar_prefetch=0,
            grid=(B // batch_tile,),
            in_specs=[
                pl.BlockSpec((batch_tile, C, HW), lambda g: (g, 0, 0)),  # x
                pl.BlockSpec((1, HW), lambda g: (0, 0)),                 # col==0 mask
                pl.BlockSpec((1, HW), lambda g: (0, 0)),                 # col==W-1 mask
                pl.BlockSpec((9, hid, Cp), lambda g: (0, 0, 0)),         # weff slabs
                pl.BlockSpec((hid, 1), lambda g: (0, 0)),                # b1
                pl.BlockSpec((C, hid), lambda g: (0, 0)),                # w2
            ],
            out_specs=pl.BlockSpec((batch_tile, C, HW), lambda g: (g, 0, 0)),
            scratch_shapes=[pltpu.VMEM((batch_tile, Cp, HW), jnp.float32)],
        ),
        compiler_params=pltpu.CompilerParams(
            dimension_semantics=("parallel",),
            vmem_limit_bytes=vmem_limit),
    )(x_flat, params["m_col0"], params["m_colw"],
      params["weff"], params["b1"], params["w2"])
    return out.reshape(B, C, H, W)


def _reference(x, w1, b1, w2):
    """Pure-JAX mirror of the PyTorch forward (NCHW), for validation."""
    B, C, H, W = x.shape
    ys = []
    for f in range(4):
        y_f = jnp.zeros_like(x)
        for a in range(3):
            for b in range(3):
                kv = float(FILTERS[f][a, b])
                if kv == 0.0:
                    continue
                y_f = y_f + kv * jnp.roll(x, (1 - a, 1 - b), axis=(2, 3))
        ys.append(y_f)
    y = jnp.stack(ys, axis=2).reshape(B, 4 * C, H, W)   # channel index = c*4+f
    h = jax.nn.relu(jnp.einsum('oi,bihw->bohw', w1, y)
                    + b1[None, :, None, None])
    out = jnp.einsum('oi,bihw->bohw', w2, h)
    return out + x


if __name__ == "__main__":
    # Small shapes consistent with the module: img_layer_depth=12, hidden=96.
    B, C, H, W, HID = 2, 12, 16, 16, 96
    key = jax.random.PRNGKey(0)
    k1, k2, k3, k4 = jax.random.split(key, 4)

    x = jax.random.normal(k1, (B, C, H, W), jnp.float32)
    # Deterministic synthetic parameters (shapes from __init__).
    # NOTE: the module zero-inits cn2.weight; we use small random values so the
    # second matmul is actually exercised (zero weight would make out == x).
    w1 = 0.1 * jax.random.normal(k2, (HID, 4 * C), jnp.float32)
    b1 = 0.1 * jax.random.normal(k3, (HID,), jnp.float32)
    w2 = 0.1 * jax.random.normal(k4, (C, HID), jnp.float32)

    # Weight fold / masks prepared once (hoisted out of any recursive loop).
    params = prepare_recursive_nn_params(w1, b1, w2, n_chan=C, height=H, width=W)

    out = jax.block_until_ready(
        recursive_nn_forward(x, w1, b1, w2, params=params))
    ref = jax.block_until_ready(_reference(x, w1, b1, w2))
    np.testing.assert_allclose(np.asarray(out), np.asarray(ref),
                               rtol=1e-4, atol=1e-4)
    print("KERNEL_OK")
</pallas_src>

<mosaic_0001>
module attributes {stable_mosaic.version = 11 : i64} {
  func.func @_recursive_nn_kernel(%arg0: i32, %arg1: memref<1x12x256xf32, #tpu.memory_space<vmem>>, %arg2: memref<1x256xf32, #tpu.memory_space<vmem>>, %arg3: memref<1x256xf32, #tpu.memory_space<vmem>>, %arg4: memref<9x96x16xf32, #tpu.memory_space<vmem>>, %arg5: memref<96x1xf32, #tpu.memory_space<vmem>>, %arg6: memref<12x96xf32, #tpu.memory_space<vmem>>, %arg7: memref<1x12x256xf32, #tpu.memory_space<vmem>>, %arg8: memref<1x16x256xf32, #tpu.memory_space<vmem>>) attributes {dimension_semantics = [#tpu.dimension_semantics<parallel>], iteration_bounds = array<i64: 2>, scalar_prefetch = 0 : i64, scratch_operands = 1 : i64, tpu.core_type = #tpu.core_type<tc>, window_params = [{transform_indices = @transform_0, window_bounds = array<i64: 1, 12, 256>}, {pipeline_mode = #tpu.pipeline_mode<synchronous>, transform_indices = @transform_1, window_bounds = array<i64: 1, 256>}, {pipeline_mode = #tpu.pipeline_mode<synchronous>, transform_indices = @transform_2, window_bounds = array<i64: 1, 256>}, {pipeline_mode = #tpu.pipeline_mode<synchronous>, transform_indices = @transform_3, window_bounds = array<i64: 9, 96, 16>}, {pipeline_mode = #tpu.pipeline_mode<synchronous>, transform_indices = @transform_4, window_bounds = array<i64: 96, 1>}, {pipeline_mode = #tpu.pipeline_mode<synchronous>, transform_indices = @transform_5, window_bounds = array<i64: 12, 96>}, {transform_indices = @transform_6, window_bounds = array<i64: 1, 12, 256>}]} {
    %cst = arith.constant 0.000000e+00 : f32
    %0 = vector.broadcast %cst : f32 to vector<1x4x256xf32>
    %c0 = arith.constant 0 : index
    %c12 = arith.constant 12 : index
    %c0_0 = arith.constant 0 : index
    %1 = vector.load %arg8[%c0, %c12, %c0_0] : memref<1x16x256xf32, #tpu.memory_space<vmem>>, vector<1x4x256xf32>
    tpu.vector_store %arg8[%c0, %c12, %c0_0], %0 {strides = array<i32>} : memref<1x16x256xf32, #tpu.memory_space<vmem>>, vector<1x4x256xf32>,
    %c0_1 = arith.constant 0 : index
    %c0_2 = arith.constant 0 : index
    %c0_3 = arith.constant 0 : index
    %2 = vector.load %arg1[%c0_1, %c0_2, %c0_3] : memref<1x12x256xf32, #tpu.memory_space<vmem>>, vector<1x12x256xf32>
    %c0_4 = arith.constant 0 : index
    %c0_5 = arith.constant 0 : index
    %c0_6 = arith.constant 0 : index
    %3 = vector.load %arg8[%c0_4, %c0_5, %c0_6] : memref<1x16x256xf32, #tpu.memory_space<vmem>>, vector<1x12x256xf32>
    tpu.vector_store %arg8[%c0_4, %c0_5, %c0_6], %2 {strides = array<i32>} : memref<1x16x256xf32, #tpu.memory_space<vmem>>, vector<1x12x256xf32>,
    %c0_7 = arith.constant 0 : index
    %c0_8 = arith.constant 0 : index
    %4 = vector.load %arg2[%c0_7, %c0_8] : memref<1x256xf32, #tpu.memory_space<vmem>>, vector<1x256xf32>
    %5 = vector.shape_cast %4 : vector<1x256xf32> to vector<1x256xf32>
    %6 = vector.broadcast %5 : vector<1x256xf32> to vector<16x256xf32>
    %cst_9 = arith.constant 0.000000e+00 : f32
    %7 = vector.broadcast %cst_9 : f32 to vector<16x256xf32>
    %8 = arith.cmpf one, %6, %7 : vector<16x256xf32>
    %c0_10 = arith.constant 0 : index
    %c0_11 = arith.constant 0 : index
    %9 = vector.load %arg3[%c0_10, %c0_11] : memref<1x256xf32, #tpu.memory_space<vmem>>, vector<1x256xf32>
    %10 = vector.shape_cast %9 : vector<1x256xf32> to vector<1x256xf32>
    %11 = vector.broadcast %10 : vector<1x256xf32> to vector<16x256xf32>
    %cst_12 = arith.constant 0.000000e+00 : f32
    %12 = vector.broadcast %cst_12 : f32 to vector<16x256xf32>
    %13 = arith.cmpf one, %11, %12 : vector<16x256xf32>
    %c0_13 = arith.constant 0 : index
    %c0_14 = arith.constant 0 : index
    %c0_15 = arith.constant 0 : index
    %14 = vector.load %arg8[%c0_13, %c0_14, %c0_15] : memref<1x16x256xf32, #tpu.memory_space<vmem>>, vector<1x16x256xf32>
    %15 = vector.shape_cast %14 : vector<1x16x256xf32> to vector<16x256xf32>
    %c241_i32 = arith.constant 241 : i32
    %16 = tpu.dynamic_rotate %15 by %c241_i32 dim 1 : vector<16x256xf32>, i32 -> vector<16x256xf32>
    %c1_i32 = arith.constant 1 : i32
    %17 = tpu.dynamic_rotate %15 by %c1_i32 dim 1 : vector<16x256xf32>, i32 -> vector<16x256xf32>
    %18 = arith.select %8, %16, %17 : vector<16x256xi1>, vector<16x256xf32>
    %c15_i32 = arith.constant 15 : i32
    %19 = tpu.dynamic_rotate %15 by %c15_i32 dim 1 : vector<16x256xf32>, i32 -> vector<16x256xf32>
    %c255_i32 = arith.constant 255 : i32
    %20 = tpu.dynamic_rotate %15 by %c255_i32 dim 1 : vector<16x256xf32>, i32 -> vector<16x256xf32>
    %21 = arith.select %13, %19, %20 : vector<16x256xi1>, vector<16x256xf32>
    %c16_i32 = arith.constant 16 : i32
    %22 = tpu.dynamic_rotate %18 by %c16_i32 dim 1 : vector<16x256xf32>, i32 -> vector<16x256xf32>
    %c240_i32 = arith.constant 240 : i32
    %23 = tpu.dynamic_rotate %18 by %c240_i32 dim 1 : vector<16x256xf32>, i32 -> vector<16x256xf32>
    %c0_16 = arith.constant 0 : index
    %c0_17 = arith.constant 0 : index
    %c0_18 = arith.constant 0 : index
    %24 = vector.load %arg4[%c0_16, %c0_17, %c0_18] : memref<9x96x16xf32, #tpu.memory_space<vmem>>, vector<1x96x16xf32>
    %25 = vector.shape_cast %24 : vector<1x96x16xf32> to vector<96x16xf32>
    %cst_19 = arith.constant dense<0.000000e+00> : vector<96x256xf32>
    %26 = tpu.matmul %25, %22, %cst_19 {dimension_numbers = #tpu.dot_dimension_numbers<[1], [0], [0], [1], [0, 0, 1, 1], [], []>} : vector<96x16xf32>, vector<16x256xf32>, vector<96x256xf32> -> vector<96x256xf32>
    %c1 = arith.constant 1 : index
    %c0_20 = arith.constant 0 : index
    %c0_21 = arith.constant 0 : index
    %27 = vector.load %arg4[%c1, %c0_20, %c0_21] : memref<9x96x16xf32, #tpu.memory_space<vmem>>, vector<1x96x16xf32>
    %28 = vector.shape_cast %27 : vector<1x96x16xf32> to vector<96x16xf32>
    %cst_22 = arith.constant dense<0.000000e+00> : vector<96x256xf32>
    %29 = tpu.matmul %28, %18, %cst_22 {dimension_numbers = #tpu.dot_dimension_numbers<[1], [0], [0], [1], [0, 0, 1, 1], [], []>} : vector<96x16xf32>, vector<16x256xf32>, vector<96x256xf32> -> vector<96x256xf32>
    %30 = arith.addf %26, %29 : vector<96x256xf32>
    %c2 = arith.constant 2 : index
    %c0_23 = arith.constant 0 : index
    %c0_24 = arith.constant 0 : index
    %31 = vector.load %arg4[%c2, %c0_23, %c0_24] : memref<9x96x16xf32, #tpu.memory_space<vmem>>, vector<1x96x16xf32>
    %32 = vector.shape_cast %31 : vector<1x96x16xf32> to vector<96x16xf32>
    %cst_25 = arith.constant dense<0.000000e+00> : vector<96x256xf32>
    %33 = tpu.matmul %32, %23, %cst_25 {dimension_numbers = #tpu.dot_dimension_numbers<[1], [0], [0], [1], [0, 0, 1, 1], [], []>} : vector<96x16xf32>, vector<16x256xf32>, vector<96x256xf32> -> vector<96x256xf32>
    %34 = arith.addf %30, %33 : vector<96x256xf32>
    %c16_i32_26 = arith.constant 16 : i32
    %35 = tpu.dynamic_rotate %15 by %c16_i32_26 dim 1 : vector<16x256xf32>, i32 -> vector<16x256xf32>
    %c240_i32_27 = arith.constant 240 : i32
    %36 = tpu.dynamic_rotate %15 by %c240_i32_27 dim 1 : vector<16x256xf32>, i32 -> vector<16x256xf32>
    %c3 = arith.constant 3 : index
    %c0_28 = arith.constant 0 : index
    %c0_29 = arith.constant 0 : index
    %37 = vector.load %arg4[%c3, %c0_28, %c0_29] : memref<9x96x16xf32, #tpu.memory_space<vmem>>, vector<1x96x16xf32>
    %38 = vector.shape_cast %37 : vector<1x96x16xf32> to vector<96x16xf32>
    %cst_30 = arith.constant dense<0.000000e+00> : vector<96x256xf32>
    %39 = tpu.matmul %38, %35, %cst_30 {dimension_numbers = #tpu.dot_dimension_numbers<[1], [0], [0], [1], [0, 0, 1, 1], [], []>} : vector<96x16xf32>, vector<16x256xf32>, vector<96x256xf32> -> vector<96x256xf32>
    %40 = arith.addf %34, %39 : vector<96x256xf32>
    %c4 = arith.constant 4 : index
    %c0_31 = arith.constant 0 : index
    %c0_32 = arith.constant 0 : index
    %41 = vector.load %arg4[%c4, %c0_31, %c0_32] : memref<9x96x16xf32, #tpu.memory_space<vmem>>, vector<1x96x16xf32>
    %42 = vector.shape_cast %41 : vector<1x96x16xf32> to vector<96x16xf32>
    %cst_33 = arith.constant dense<0.000000e+00> : vector<96x256xf32>
    %43 = tpu.matmul %42, %15, %cst_33 {dimension_numbers = #tpu.dot_dimension_numbers<[1], [0], [0], [1], [0, 0, 1, 1], [], []>} : vector<96x16xf32>, vector<16x256xf32>, vector<96x256xf32> -> vector<96x256xf32>
    %44 = arith.addf %40, %43 : vector<96x256xf32>
    %c5 = arith.constant 5 : index
    %c0_34 = arith.constant 0 : index
    %c0_35 = arith.constant 0 : index
    %45 = vector.load %arg4[%c5, %c0_34, %c0_35] : memref<9x96x16xf32, #tpu.memory_space<vmem>>, vector<1x96x16xf32>
    %46 = vector.shape_cast %45 : vector<1x96x16xf32> to vector<96x16xf32>
    %cst_36 = arith.constant dense<0.000000e+00> : vector<96x256xf32>
    %47 = tpu.matmul %46, %36, %cst_36 {dimension_numbers = #tpu.dot_dimension_numbers<[1], [0], [0], [1], [0, 0, 1, 1], [], []>} : vector<96x16xf32>, vector<16x256xf32>, vector<96x256xf32> -> vector<96x256xf32>
    %48 = arith.addf %44, %47 : vector<96x256xf32>
    %c16_i32_37 = arith.constant 16 : i32
    %49 = tpu.dynamic_rotate %21 by %c16_i32_37 dim 1 : vector<16x256xf32>, i32 -> vector<16x256xf32>
    %c240_i32_38 = arith.constant 240 : i32
    %50 = tpu.dynamic_rotate %21 by %c240_i32_38 dim 1 : vector<16x256xf32>, i32 -> vector<16x256xf32>
    %c6 = arith.constant 6 : index
    %c0_39 = arith.constant 0 : index
    %c0_40 = arith.constant 0 : index
    %51 = vector.load %arg4[%c6, %c0_39, %c0_40] : memref<9x96x16xf32, #tpu.memory_space<vmem>>, vector<1x96x16xf32>
    %52 = vector.shape_cast %51 : vector<1x96x16xf32> to vector<96x16xf32>
    %cst_41 = arith.constant dense<0.000000e+00> : vector<96x256xf32>
    %53 = tpu.matmul %52, %49, %cst_41 {dimension_numbers = #tpu.dot_dimension_numbers<[1], [0], [0], [1], [0, 0, 1, 1], [], []>} : vector<96x16xf32>, vector<16x256xf32>, vector<96x256xf32> -> vector<96x256xf32>
    %54 = arith.addf %48, %53 : vector<96x256xf32>
    %c7 = arith.constant 7 : index
    %c0_42 = arith.constant 0 : index
    %c0_43 = arith.constant 0 : index
    %55 = vector.load %arg4[%c7, %c0_42, %c0_43] : memref<9x96x16xf32, #tpu.memory_space<vmem>>, vector<1x96x16xf32>
    %56 = vector.shape_cast %55 : vector<1x96x16xf32> to vector<96x16xf32>
    %cst_44 = arith.constant dense<0.000000e+00> : vector<96x256xf32>
    %57 = tpu.matmul %56, %21, %cst_44 {dimension_numbers = #tpu.dot_dimension_numbers<[1], [0], [0], [1], [0, 0, 1, 1], [], []>} : vector<96x16xf32>, vector<16x256xf32>, vector<96x256xf32> -> vector<96x256xf32>
    %58 = arith.addf %54, %57 : vector<96x256xf32>
    %c8 = arith.constant 8 : index
    %c0_45 = arith.constant 0 : index
    %c0_46 = arith.constant 0 : index
    %59 = vector.load %arg4[%c8, %c0_45, %c0_46] : memref<9x96x16xf32, #tpu.memory_space<vmem>>, vector<1x96x16xf32>
    %60 = vector.shape_cast %59 : vector<1x96x16xf32> to vector<96x16xf32>
    %cst_47 = arith.constant dense<0.000000e+00> : vector<96x256xf32>
    %61 = tpu.matmul %60, %50, %cst_47 {dimension_numbers = #tpu.dot_dimension_numbers<[1], [0], [0], [1], [0, 0, 1, 1], [], []>} : vector<96x16xf32>, vector<16x256xf32>, vector<96x256xf32> -> vector<96x256xf32>
    %62 = arith.addf %58, %61 : vector<96x256xf32>
    %c0_48 = arith.constant 0 : index
    %c0_49 = arith.constant 0 : index
    %63 = vector.load %arg5[%c0_48, %c0_49] : memref<96x1xf32, #tpu.memory_space<vmem>>, vector<96x1xf32>
    %64 = vector.broadcast %63 : vector<96x1xf32> to vector<96x256xf32>
    %65 = arith.addf %62, %64 : vector<96x256xf32>
    %cst_50 = arith.constant 0.000000e+00 : f32
    %66 = vector.broadcast %cst_50 : f32 to vector<96x256xf32>
    %67 = arith.maximumf %65, %66 : vector<96x256xf32>
    %c0_51 = arith.constant 0 : index
    %c0_52 = arith.constant 0 : index
    %68 = vector.load %arg6[%c0_51, %c0_52] : memref<12x96xf32, #tpu.memory_space<vmem>>, vector<12x96xf32>
    %cst_53 = arith.constant dense<0.000000e+00> : vector<12x256xf32>
    %69 = tpu.matmul %68, %67, %cst_53 {dimension_numbers = #tpu.dot_dimension_numbers<[1], [0], [0], [1], [0, 0, 1, 1], [], []>} : vector<12x96xf32>, vector<96x256xf32>, vector<12x256xf32> -> vector<12x256xf32>
    %c0_54 = arith.constant 0 : index
    %c0_55 = arith.constant 0 : index
    %c0_56 = arith.constant 0 : index
    %70 = vector.load %arg1[%c0_54, %c0_55, %c0_56] : memref<1x12x256xf32, #tpu.memory_space<vmem>>, vector<1x12x256xf32>
    %71 = vector.shape_cast %70 : vector<1x12x256xf32> to vector<12x256xf32>
    %72 = arith.addf %69, %71 : vector<12x256xf32>
    %c0_57 = arith.constant 0 : index
    %c0_58 = arith.constant 0 : index
    %c0_59 = arith.constant 0 : index
    %73 = vector.load %arg7[%c0_57, %c0_58, %c0_59] : memref<1x12x256xf32, #tpu.memory_space<vmem>>, vector<1x12x256xf32>
    %74 = vector.shape_cast %73 : vector<1x12x256xf32> to vector<12x256xf32>
    %75 = vector.shape_cast %72 : vector<12x256xf32> to vector<1x12x256xf32>
    tpu.vector_store %arg7[%c0_57, %c0_58, %c0_59], %75 {strides = array<i32>} : memref<1x12x256xf32, #tpu.memory_space<vmem>>, vector<1x12x256xf32>,
    return
  }
  func.func @transform_0(%arg0: i32) -> (i32, i32, i32) {
    %c0_i32 = arith.constant 0 : i32
    %c0_i32_0 = arith.constant 0 : i32
    %c0_i32_1 = arith.constant 0 : i32
    return %arg0, %c0_i32, %c0_i32_0 : i32, i32, i32
  }
  func.func @transform_1(%arg0: i32) -> (i32, i32) {
    %c0_i32 = arith.constant 0 : i32
    %c0_i32_0 = arith.constant 0 : i32
    %c0_i32_1 = arith.constant 0 : i32
    return %c0_i32, %c0_i32_0 : i32, i32
  }
  func.func @transform_2(%arg0: i32) -> (i32, i32) {
    %c0_i32 = arith.constant 0 : i32
    %c0_i32_0 = arith.constant 0 : i32
    %c0_i32_1 = arith.constant 0 : i32
    return %c0_i32, %c0_i32_0 : i32, i32
  }
  func.func @transform_3(%arg0: i32) -> (i32, i32, i32) {
    %c0_i32 = arith.constant 0 : i32
    %c0_i32_0 = arith.constant 0 : i32
    %c0_i32_1 = arith.constant 0 : i32
    %c0_i32_2 = arith.constant 0 : i32
    return %c0_i32, %c0_i32_0, %c0_i32_1 : i32, i32, i32
  }
  func.func @transform_4(%arg0: i32) -> (i32, i32) {
    %c0_i32 = arith.constant 0 : i32
    %c0_i32_0 = arith.constant 0 : i32
    %c0_i32_1 = arith.constant 0 : i32
    return %c0_i32, %c0_i32_0 : i32, i32
  }
  func.func @transform_5(%arg0: i32) -> (i32, i32) {
    %c0_i32 = arith.constant 0 : i32
    %c0_i32_0 = arith.constant 0 : i32
    %c0_i32_1 = arith.constant 0 : i32
    return %c0_i32, %c0_i32_0 : i32, i32
  }
  func.func @transform_6(%arg0: i32) -> (i32, i32, i32) {
    %c0_i32 = arith.constant 0 : i32
    %c0_i32_0 = arith.constant 0 : i32
    %c0_i32_1 = arith.constant 0 : i32
    return %arg0, %c0_i32, %c0_i32_0 : i32, i32, i32
  }
}

</mosaic_0001>

<bundles_post_ra>
// kernel: tpu_custom_call.1
= control target key start
LH: loop header
LB: loop body
LE: loop exit
PB: predicated region body
PF: predicated region fallthrough
CT: control target
= control target key end

     0   :  { %s3181_s21 = smov 0   ;;  %s4001_s0 = inlined_call_operand.vmem [shape: f32[2,12,256], index: 0, kind: input, shape index: {}]   ;;  %s4002_s1 = inlined_call_operand.vmem [shape: f32[1,256], index: 1, kind: input, shape index: {}]   ;;  %s4003_s2 = inlined_call_operand.vmem [shape: f32[1,256], index: 2, kind: input, shape index: {}]   ;;  %s4004_s3 = inlined_call_operand.vmem [shape: f32[9,96,16], index: 3, kind: input, shape index: {}]   ;;  %s4005_s4 = inlined_call_operand.vmem [shape: f32[96,1], index: 4, kind: input, shape index: {}]   ;;  %s4006_s5 = inlined_call_operand.vmem [shape: f32[12,96], index: 5, kind: input, shape index: {}]   ;;  %s4007_s6 = inlined_call_operand.vmem [shape: f32[2,12,256], index: 6, kind: output, shape index: {}]  }
   0x1 LB: > { %s2541_s22 = sadd.s32 4294967295, %s3136_s21   ;;  %p2545_p0 = scmp.ge.s32.totalorder %s3136_s21, 1  ;;  %s3136_s21 = sphi %s3181_s21, %s16_s21  }
   0x2   : > { %p212_p1 = scmp.lt.s32.totalorder %s3136_s21, 3 }
   0x4   : > { %p213_p2 = pnand %p2545_p0, %p212_p1 }
   0x5   : > { %p242_p3 = scmp.lt.s32.totalorder (!%p213_p2), %s2541_s22, 1  ;;  %v3138_v0 = vmov (!%p213_p2), 0.0   ;;  %s3139_s27 = smov (!%p213_p2), 1   ;;  %vm407_vm0 = vcmask (!%p213_p2), 130048   ;;  %v2634_v11 = vld [vmem:[%s4004_s3 + $0x180] sm:$0xff] (!%p213_p2)  ;;  %v2635_v12 = vld [vmem:[%s4004_s3 + $0x188] sm:$0xff] (!%p213_p2)  ;;  %v264_v23 = vlaneseq (!%p213_p2) }
   0x6   : > { %216 = sbr.rel (%p213_p2) target bundleno = 869 (0x365), region = 44  ;;  %252 = vst [vmem:[#allocation2 + $0x10] sm:$0xf0] (!%p213_p2), %v3138_v0  ;;  %253 = vst [vmem:[#allocation2 + $0x18] sm:$0xf0] (!%p213_p2), %v3138_v0  ;;  %1311 = vmatprep.mubr.f32.mxu0 (!%p213_p2), %v3138_v0  ;;  %508 = vmatprep.mubr.f32.mxu1 (!%p213_p2), %v3138_v0  ;;  %s3140_s28 = smov (!%p213_p2), 113  }
   0x7   : > { %s3141_s29 = smov (!%p213_p2), 15   ;;  %s3142_s30 = smov (!%p213_p2), 127   ;;  %v2636_v13 = vld [vmem:[%s4004_s3 + $0x190] sm:$0xff] (!%p213_p2)  ;;  %v2637_v14 = vld [vmem:[%s4004_s3 + $0x198] sm:$0xff] (!%p213_p2)  ;;  %v2638_v15 = vld [vmem:[%s4004_s3 + $0x1a0] sm:$0xff] (!%p213_p2)  ;;  %v265_v24 = vshrl.u32 (!%p213_p2), %v264_v23, 7 }
   0x8   : > { %s3143_s7 = smov (!%p213_p2), 112   ;;  %v2639_v16 = vld [vmem:[%s4004_s3 + $0x1a8] sm:$0xff] (!%p213_p2)  ;;  %v2640_v17 = vld [vmem:[%s4004_s3 + $0x1b0] sm:$0xff] (!%p213_p2)  ;;  %v2641_v18 = vld [vmem:[%s4004_s3 + $0x1b8] sm:$0xff] (!%p213_p2)  ;;  %v3286_v28 = vand.u32 (!%p213_p2), 127, %v264_v23  ;;  %s3144_s17 = smov (!%p213_p2), 16  }
   0x9   : > { %v2642_v19 = vld [vmem:[%s4004_s3 + $0x1c0] sm:$0xff] (!%p213_p2)  ;;  %v2643_v20 = vld [vmem:[%s4004_s3 + $0x1c8] sm:$0xff] (!%p213_p2)  ;;  %v2644_v21 = vld [vmem:[%s4004_s3 + $0x1d0] sm:$0xff] (!%p213_p2)  ;;  %v270_v25 = vsub.s32 (!%p213_p2), 1, %v265_v24  ;;  %v266_v27 = vsub.s32 (!%p213_p2), 0, %v265_v24  ;;  %vm2398_vm11 = vcmask (!%p213_p2), 785408  }
   0xa   : > { %v2645_v22 = vld [vmem:[%s4004_s3 + $0x1d8] sm:$0xff] (!%p213_p2)  ;;  %v262_v26 = vld [vmem:[%s4002_s1] sm:$0x3] (!%p213_p2)  ;;  %vm317_vm1 = vcmp.lt.s32.totalorder (!%p213_p2), %v3286_v28, 1  ;;  %vm304_vm2 = vcmp.lt.s32.totalorder (!%p213_p2), %v3286_v28, 113  ;;  %vm334_vm4 = vcmp.lt.s32.totalorder (!%p213_p2), %v3286_v28, 15 }
   0xb   : > { %v271_v29 = vrot.slane (!%p213_p2), %v262_v26, %v270_v25  ;;  %v267_v32 = vrot.slane (!%p213_p2), %v262_v26, %v266_v27  ;;  %v276_v33 = vld [vmem:[%s4003_s2] sm:$0x3] (!%p213_p2)  ;;  %vm347_vm6 = vcmp.lt.s32.totalorder (!%p213_p2), %v3286_v28, 127  ;;  %vm377_vm9 = vcmp.lt.s32.totalorder (!%p213_p2), %v3286_v28, 112 }
   0xc   : > { %v285_v44 = vrot.slane (!%p213_p2), %v276_v33, %v270_v25  ;;  %v281_v45 = vrot.slane (!%p213_p2), %v276_v33, %v266_v27  ;;  %vm364_vm10 = vcmp.lt.s32.totalorder (!%p213_p2), %v3286_v28, 16  ;;  %v2588_v28 = vld [vmem:[%s4004_s3 + $0xd0] sm:$0xff] (!%p213_p2) }
   0xd   : > { %s4009_s22 = smov (!%p242_p3, %s2541_s22), 1  ;;  %vm275_vm3 = vcmp.ne.f32.partialorder %v271_v29, 0.0  ;;  %vm274_vm5 = vcmp.ne.f32.partialorder %v267_v32, 0.0 }
   0xe   : > { %s2758_s23 = sshll.u32 %s4009_s22, 5  ;;  %vm289_vm7 = vcmp.ne.f32.partialorder %v285_v44, 0.0  ;;  %vm288_vm8 = vcmp.ne.f32.partialorder %v281_v45, 0.0  ;;  %v2552_v44 = vld [vmem:[%s4004_s3 + $0x70] sm:$0xff]  ;;  %v2658_v45 = vld [vmem:[%s4004_s3 + $0x1e0] sm:$0xff] }
   0xf   : > { %s3201_s26 = scalar_lea.vmem %s4001_s0, %s2758_s23  ;;  %s251_s20 = scalar_lea.vmem %s4007_s6, %s2758_s23 }
  0x10   : > { %v254_v1 = vld [vmem:[%s3201_s26] sm:$0xff]  ;;  %v256_v2 = vld [vmem:[%s3201_s26 + $0x10] sm:$0xf]  ;;  %v255_v3 = vld [vmem:[%s3201_s26 + $0x8] sm:$0xff] }
  0x11   : > { %260 = vst [vmem:[#allocation2 + $0x10] sm:$0xf] %v256_v2  ;;  %v257_v4 = vld [vmem:[%s3201_s26 + $0x18] sm:$0xf] }
  0x12   : > { %261 = vst [vmem:[#allocation2 + $0x18] sm:$0xf] %v257_v4 }
  0x18   : > { %v292_v5 = vld [vmem:[#allocation2 + $0x10] sm:$0xff] }
  0x19   : > { %v3207_v6 = vpack.i.bf16 %v292_v5, %v254_v1  ;;  %v293_v7 = vld [vmem:[#allocation2 + $0x18] sm:$0xff]  ;;  %v2778_v10 = vpack.c.bf16 %v292_v5, %v254_v1 }
  0x1a   : > { %v3211_v8 = vpack.i.bf16 %v293_v7, %v255_v3  ;;  %v2776_v9 = vpack.c.bf16 %v293_v7, %v255_v3 }
  0x1b   : > { %3039 = vrot.lane.b32.xlu1 %v3207_v6, %s3139_s27  ;;  %3029 = vrot.lane.b32.xlu0 %v3207_v6, %s3140_s28 }
  0x1c   : > { %2777 = vmatprep.subr.bf16.mxu0 %v2776_v9 }
  0x1d   : > { %2779 = vmatpush1.bf16.msra.mxu0 %v2778_v10 }
  0x1f   : > { %3044 = vrot.lane.b32.xlu1 %v3211_v8, %s3139_s27  ;;  %3034 = vrot.lane.b32.xlu0 %v3211_v8, %s3140_s28 }
  0x20   : > { %2646 = vmatmul.mubr.msk.f32.vlgmr.msra.gmra.mrb[0].mxu0 %vm407_vm0, %v2634_v11 }
  0x21   : > { %1317 = vmatprep.mubr.f32.mxu0 %v3138_v0 }
  0x23   : > { %3054 = vrot.lane.b32.xlu1 %v3211_v8, %s3141_s29  ;;  %3049 = vrot.lane.b32.xlu0 %v3207_v6, %s3141_s29 }
  0x24   : > { %2647 = vmatmul.mubr.msk.f32.gmra.mrb[2].mxu0 %vm407_vm0, %v2635_v12 }
  0x25   : > { %1323 = vmatprep.mubr.f32.mxu0 %v3138_v0 }
  0x27   : > { %3064 = vrot.lane.b32.xlu1 %v3211_v8, %s3142_s30  ;;  %3059 = vrot.lane.b32.xlu0 %v3207_v6, %s3142_s30 }
  0x28   : > { %2648 = vmatmul.mubr.msk.f32.gmra.mrb[4].mxu0 %vm407_vm0, %v2636_v13 }
  0x29   : > { %1329 = vmatprep.mubr.f32.mxu0 %v3138_v0 }
  0x2b   : > { %3074 = vrot.lane.b32.xlu1 %v3211_v8, %s3143_s7  ;;  %3069 = vrot.lane.b32.xlu0 %v3207_v6, %s3143_s7 }
  0x2c   : > { %2649 = vmatmul.mubr.msk.f32.gmra.mrb[6].mxu0 %vm407_vm0, %v2637_v14 }
  0x2d   : > { %1335 = vmatprep.mubr.f32.mxu0 %v3138_v0 }
  0x30   : > { %2650 = vmatmul.mubr.msk.f32.gmra.mrb[8].mxu0 %vm407_vm0, %v2638_v15 }
  0x31   : > { %1341 = vmatprep.mubr.f32.mxu0 %v3138_v0 }
  0x34   : > { %2651 = vmatmul.mubr.msk.f32.gmra.mrb[10].mxu0 %vm407_vm0, %v2639_v16 }
  0x35   : > { %1347 = vmatprep.mubr.f32.mxu0 %v3138_v0 }
  0x38   : > { %2652 = vmatmul.mubr.msk.f32.gmra.mrb[12].mxu0 %vm407_vm0, %v2640_v17 }
  0x39   : > { %1353 = vmatprep.mubr.f32.mxu0 %v3138_v0 }
  0x3c   : > { %2653 = vmatmul.mubr.msk.f32.gmra.mrb[14].mxu0 %vm407_vm0, %v2641_v18 }
  0x3d   : > { %1359 = vmatprep.mubr.f32.mxu0 %v3138_v0 }
  0x40   : > { %2654 = vmatmul.mubr.msk.f32.gmra.mrb[16].mxu0 %vm407_vm0, %v2642_v19 }
  0x41   : > { %1365 = vmatprep.mubr.f32.mxu0 %v3138_v0 }
  0x44   : > { %2655 = vmatmul.mubr.msk.f32.gmra.mrb[18].mxu0 %vm407_vm0, %v2643_v20 }
  0x45   : > { %1371 = vmatprep.mubr.f32.mxu0 %v3138_v0 }
  0x48   : > { %2656 = vmatmul.mubr.msk.f32.gmra.mrb[20].mxu0 %vm407_vm0, %v2644_v21 }
  0x49   : > { %1377 = vmatprep.mubr.f32.mxu0 %v3138_v0 }
  0x4c   : > { %2657 = vmatmul.mubr.msk.f32.gmra.mrb[22].mxu0 %vm407_vm0, %v2645_v22 }
  0x4d   : > { %1521 = vmatprep.mubr.f32.mxu0 %v3138_v0 }
  0x8d   : > { %v3040_v30 = vpop.permute.xlu1 %3039  ;;  %v3030_v31 = vpop.permute.xlu0 %3029 }
  0x8e   : > { %v3042_v34 = vunpack.i.h.bf16 %v3040_v30  ;;  %v3041_v35 = vunpack.i.l.bf16 %v3040_v30  ;;  %v3032_v42 = vunpack.i.h.bf16 %v3030_v31  ;;  %v3031_v43 = vunpack.i.l.bf16 %v3030_v31  ;;  %v2550_v30 = vld [vmem:[%s4004_s3 + $0x60] sm:$0xff] }
  0x91   : > { %v3045_v36 = vpop.permute.xlu1 %3044  ;;  %v3035_v37 = vpop.permute.xlu0 %3034 }
  0x92   : > { %v3047_v38 = vunpack.i.h.bf16 %v3045_v36  ;;  %v3046_v39 = vunpack.i.l.bf16 %v3045_v36  ;;  %v3037_v40 = vunpack.i.h.bf16 %v3035_v37  ;;  %v3036_v41 = vunpack.i.l.bf16 %v3035_v37 }
  0x94   : > { %v318_v46 = vsel %vm317_vm1, %v3041_v35, %v3046_v39  ;;  %v319_v47 = vsel %vm317_vm1, %v3042_v34, %v3047_v38  ;;  %v320_v48 = vsel %vm317_vm1, %v3046_v39, %v3041_v35  ;;  %v321_v49 = vsel %vm317_vm1, %v3047_v38, %v3042_v34 }
  0x95   : > { %v305_v50 = vsel %vm304_vm2, %v3031_v43, %v3036_v41  ;;  %v306_v51 = vsel %vm304_vm2, %v3032_v42, %v3037_v40  ;;  %v307_v52 = vsel %vm304_vm2, %v3036_v41, %v3031_v43  ;;  %v308_v53 = vsel %vm304_vm2, %v3037_v40, %v3032_v42  ;;  %v3055_v54 = vpop.permute.xlu1 %3054  ;;  %v3050_v55 = vpop.permute.xlu0 %3049  ;;  %v2551_v43 = vld [vmem:[%s4004_s3 + $0x68] sm:$0xff] }
  0x96   : > { %v3057_v56 = vunpack.i.h.bf16 %v3055_v54  ;;  %v3056_v57 = vunpack.i.l.bf16 %v3055_v54  ;;  %v3052_v58 = vunpack.i.h.bf16 %v3050_v55  ;;  %v3051_v59 = vunpack.i.l.bf16 %v3050_v55  ;;  %v2558_v54 = vld [vmem:[%s4004_s3 + $0xa0] sm:$0xff]  ;;  %v2664_v55 = vld [vmem:[%s4004_s3 + $0x210] sm:$0xff] }
  0x97   : > { %v323_v60 = vsel %vm275_vm3, %v307_v52, %v318_v46  ;;  %v325_v61 = vsel %vm275_vm3, %v308_v53, %v319_v47  ;;  %v322_v62 = vsel %vm274_vm5, %v305_v50, %v320_v48  ;;  %v324_v63 = vsel %vm274_vm5, %v306_v51, %v321_v49  ;;  %v2553_v46 = vld [vmem:[%s4004_s3 + $0x78] sm:$0xff]  ;;  %v2659_v47 = vld [vmem:[%s4004_s3 + $0x1e8] sm:$0xff]  ;;  %v2556_v50 = vld [vmem:[%s4004_s3 + $0x90] sm:$0xff] }
  0x98   : > { %v336_v1 = vsel %vm334_vm4, %v3052_v58, %v3057_v56  ;;  %v3083_v2 = vpack.i.bf16 %v325_v61, %v323_v60  ;;  %v2760_v3 = vpack.c.bf16 %v325_v61, %v323_v60  ;;  %v3078_v4 = vpack.i.bf16 %v324_v63, %v322_v62  ;;  %v2555_v48 = vld [vmem:[%s4004_s3 + $0x88] sm:$0xff]  ;;  %v2661_v49 = vld [vmem:[%s4004_s3 + $0x1f8] sm:$0xff]  ;;  %v2662_v51 = vld [vmem:[%s4004_s3 + $0x200] sm:$0xff] }
  0x99   : > { %v3065_v5 = vpop.permute.xlu1 %3064  ;;  %v3060_v7 = vpop.permute.xlu0 %3059  ;;  %v2762_v9 = vpack.c.bf16 %v324_v63, %v322_v62  ;;  %v338_v14 = vsel %vm334_vm4, %v3057_v56, %v3052_v58  ;;  %v335_v15 = vsel %vm334_vm4, %v3051_v59, %v3056_v57  ;;  %v337_v16 = vsel %vm334_vm4, %v3056_v57, %v3051_v59  ;;  %v2557_v52 = vld [vmem:[%s4004_s3 + $0x98] sm:$0xff]  ;;  %v2663_v53 = vld [vmem:[%s4004_s3 + $0x208] sm:$0xff]  ;;  %v2560_v58 = vld [vmem:[%s4004_s3 + $0xb0] sm:$0xff] }
  0x9a   : > { %v3067_v10 = vunpack.i.h.bf16 %v3065_v5  ;;  %v3066_v11 = vunpack.i.l.bf16 %v3065_v5  ;;  %v3062_v12 = vunpack.i.h.bf16 %v3060_v7  ;;  %v3061_v13 = vunpack.i.l.bf16 %v3060_v7  ;;  %3084 = vrot.lane.b32.xlu1 %v3083_v2, %s3144_s17  ;;  %2761 = vmatprep.subr.bf16.mxu1 %v2760_v3  ;;  %v2559_v56 = vld [vmem:[%s4004_s3 + $0xa8] sm:$0xff]  ;;  %v2665_v57 = vld [vmem:[%s4004_s3 + $0x218] sm:$0xff]  ;;  %v2666_v59 = vld [vmem:[%s4004_s3 + $0x220] sm:$0xff] }
  0x9b   : > { %3079 = vrot.lane.b32.xlu0 %v3078_v4, %s3144_s17  ;;  %2763 = vmatpush1.bf16.msra.mxu1 %v2762_v9  ;;  %v2561_v60 = vld [vmem:[%s4004_s3 + $0xb8] sm:$0xff]  ;;  %v2667_v61 = vld [vmem:[%s4004_s3 + $0x228] sm:$0xff]  ;;  %v2668_v62 = vld [vmem:[%s4004_s3 + $0x230] sm:$0xff] }
  0x9c   : > { %v349_v17 = vsel %vm347_vm6, %v3062_v12, %v3067_v10  ;;  %v351_v18 = vsel %vm347_vm6, %v3067_v10, %v3062_v12  ;;  %v348_v19 = vsel %vm347_vm6, %v3061_v13, %v3066_v11  ;;  %v350_v20 = vsel %vm347_vm6, %v3066_v11, %v3061_v13  ;;  %v2669_v63 = vld [vmem:[%s4004_s3 + $0x238] sm:$0xff] }
  0x9d   : > { %v3334_v21 = vsel %vm289_vm7, %v335_v15, %v350_v20  ;;  %v3337_v22 = vsel %vm289_vm7, %v336_v1, %v351_v18  ;;  %v3340_v23 = vsel %vm288_vm8, %v337_v16, %v348_v19  ;;  %v3343_v24 = vsel %vm288_vm8, %v338_v14, %v349_v17  ;;  %v3075_v25 = vpop.permute.xlu1 %3074  ;;  %v3070_v26 = vpop.permute.xlu0 %3069 }
  0x9e   : > { %v3093_v27 = vpack.i.bf16 %v3337_v22, %v3334_v21  ;;  %v3088_v29 = vpack.i.bf16 %v3343_v24, %v3340_v23  ;;  %v3077_v31 = vunpack.i.h.bf16 %v3075_v25  ;;  %v3076_v32 = vunpack.i.l.bf16 %v3075_v25  ;;  %2562 = vmatmul.mubr.msk.f32.vlgmr.msra.gmra.mrb[0].mxu1 %vm407_vm0, %v2550_v30 }
  0x9f   : > { %v3072_v33 = vunpack.i.h.bf16 %v3070_v26  ;;  %v3071_v34 = vunpack.i.l.bf16 %v3070_v26  ;;  %v2788_v35 = vpack.c.bf16 %v3337_v22, %v3334_v21  ;;  %v2790_v36 = vpack.c.bf16 %v3343_v24, %v3340_v23  ;;  %514 = vmatprep.mubr.f32.mxu1 %v3138_v0  ;;  %v384_v21 = vld [vmem:[%s4004_s3 + $0x10] sm:$0xff]  ;;  %v2683_v22 = vld [vmem:[%s4004_s3 + $0x248] sm:$0xff] }
  0xa0   : > { %3094 = vrot.lane.b32.xlu1 %v3093_v27, %s3144_s17  ;;  %3089 = vrot.lane.b32.xlu0 %v3088_v29, %s3144_s17 }
  0xa1   : > { %v985_v37 = vsel %vm377_vm9, %v3072_v33, %v3077_v31  ;;  %v984_v38 = vsel %vm377_vm9, %v3071_v34, %v3076_v32  ;;  %v986_v39 = vsel %vm377_vm9, %v3076_v32, %v3071_v34  ;;  %v987_v40 = vsel %vm377_vm9, %v3077_v31, %v3072_v33 }
  0xa2   : > { %v2782_v41 = vpack.c.bf16 %v985_v37, %v984_v38  ;;  %v2780_v42 = vpack.c.bf16 %v987_v40, %v986_v39  ;;  %2563 = vmatmul.mubr.msk.f32.gmra.mrb[2].mxu1 %vm407_vm0, %v2551_v43  ;;  %v383_v43 = vld [vmem:[%s4004_s3 + $0x8] sm:$0xff] }
  0xa3   : > { %520 = vmatprep.mubr.f32.mxu1 %v3138_v0 }
  0xa4   : > { %3104 = vrot.lane.b32.xlu1 %v3083_v2, %s3143_s7  ;;  %3099 = vrot.lane.b32.xlu0 %v3078_v4, %s3143_s7 }
  0xa5   : > { %2781 = vmatprep.subr.bf16.mxu0 %v2780_v42 }
  0xa6   : > { %2783 = vmatpush1.bf16.msra.mxu0 %v2782_v41  ;;  %2564 = vmatmul.mubr.msk.f32.gmra.mrb[4].mxu1 %vm407_vm0, %v2552_v44 }
  0xa7   : > { %526 = vmatprep.mubr.f32.mxu1 %v3138_v0 }
  0xa8   : > { %3114 = vrot.lane.b32.xlu1 %v3211_v8, %s3144_s17  ;;  %3109 = vrot.lane.b32.xlu0 %v3207_v6, %s3144_s17  ;;  %v2554_v6 = vld [vmem:[%s4004_s3 + $0x80] sm:$0xff]  ;;  %v2660_v8 = vld [vmem:[%s4004_s3 + $0x1f0] sm:$0xff] }
  0xa9   : > { %2670 = vmatmul.mubr.msk.f32.vlgmr.msra.gmra.mrb[0].mxu0 %vm407_vm0, %v2658_v45  ;;  %v2682_v45 = vld [vmem:[%s4004_s3 + $0x240] sm:$0xff] }
  0xaa   : > { %1527 = vmatprep.mubr.f32.mxu0 %v3138_v0  ;;  %2565 = vmatmul.mubr.msk.f32.gmra.mrb[6].mxu1 %vm407_vm0, %v2553_v46 }
  0xab   : > { %532 = vmatprep.mubr.f32.mxu1 %v3138_v0 }
  0xac   : > { %3124 = vrot.lane.b32.xlu1 %v3093_v27, %s3143_s7  ;;  %3119 = vrot.lane.b32.xlu0 %v3088_v29, %s3143_s7  ;;  %v382_v27 = vld [vmem:[%s4004_s3] sm:$0xff] }
  0xad   : > { %2671 = vmatmul.mubr.msk.f32.gmra.mrb[2].mxu0 %vm407_vm0, %v2659_v47 }
  0xae   : > { %1533 = vmatprep.mubr.f32.mxu0 %v3138_v0  ;;  %2566 = vmatmul.mubr.msk.f32.gmra.mrb[8].mxu1 %vm407_vm0, %v2554_v6 }
  0xaf   : > { %538 = vmatprep.mubr.f32.mxu1 %v3138_v0 }
  0xb1   : > { %2672 = vmatmul.mubr.msk.f32.gmra.mrb[4].mxu0 %vm407_vm0, %v2660_v8 }
  0xb2   : > { %1539 = vmatprep.mubr.f32.mxu0 %v3138_v0  ;;  %2567 = vmatmul.mubr.msk.f32.gmra.mrb[10].mxu1 %vm407_vm0, %v2555_v48 }
  0xb3   : > { %544 = vmatprep.mubr.f32.mxu1 %v3138_v0 }
  0xb5   : > { %2673 = vmatmul.mubr.msk.f32.gmra.mrb[6].mxu0 %vm407_vm0, %v2661_v49 }
  0xb6   : > { %1545 = vmatprep.mubr.f32.mxu0 %v3138_v0  ;;  %2568 = vmatmul.mubr.msk.f32.gmra.mrb[12].mxu1 %vm407_vm0, %v2556_v50 }
  0xb7   : > { %550 = vmatprep.mubr.f32.mxu1 %v3138_v0 }
  0xb9   : > { %2674 = vmatmul.mubr.msk.f32.gmra.mrb[8].mxu0 %vm407_vm0, %v2662_v51 }
  0xba   : > { %1551 = vmatprep.mubr.f32.mxu0 %v3138_v0  ;;  %2569 = vmatmul.mubr.msk.f32.gmra.mrb[14].mxu1 %vm407_vm0, %v2557_v52 }
  0xbb   : > { %556 = vmatprep.mubr.f32.mxu1 %v3138_v0 }
  0xbd   : > { %2675 = vmatmul.mubr.msk.f32.gmra.mrb[10].mxu0 %vm407_vm0, %v2663_v53 }
  0xbe   : > { %1557 = vmatprep.mubr.f32.mxu0 %v3138_v0  ;;  %2570 = vmatmul.mubr.msk.f32.gmra.mrb[16].mxu1 %vm407_vm0, %v2558_v54 }
  0xbf   : > { %562 = vmatprep.mubr.f32.mxu1 %v3138_v0 }
  0xc1   : > { %2676 = vmatmul.mubr.msk.f32.gmra.mrb[12].mxu0 %vm407_vm0, %v2664_v55 }
  0xc2   : > { %1563 = vmatprep.mubr.f32.mxu0 %v3138_v0  ;;  %2571 = vmatmul.mubr.msk.f32.gmra.mrb[18].mxu1 %vm407_vm0, %v2559_v56 }
  0xc3   : > { %568 = vmatprep.mubr.f32.mxu1 %v3138_v0 }
  0xc5   : > { %2677 = vmatmul.mubr.msk.f32.gmra.mrb[14].mxu0 %vm407_vm0, %v2665_v57 }
  0xc6   : > { %1569 = vmatprep.mubr.f32.mxu0 %v3138_v0  ;;  %2572 = vmatmul.mubr.msk.f32.gmra.mrb[20].mxu1 %vm407_vm0, %v2560_v58  ;;  %v385_v58 = vld [vmem:[%s4004_s3 + $0x18] sm:$0xff] }
  0xc7   : > { %574 = vmatprep.mubr.f32.mxu1 %v3138_v0 }
  0xc9   : > { %2678 = vmatmul.mubr.msk.f32.gmra.mrb[16].mxu0 %vm407_vm0, %v2666_v59  ;;  %v2684_v59 = vld [vmem:[%s4004_s3 + $0x250] sm:$0xff] }
  0xca   : > { %1575 = vmatprep.mubr.f32.mxu0 %v3138_v0  ;;  %2573 = vmatmul.mubr.msk.f32.gmra.mrb[22].mxu1 %vm407_vm0, %v2561_v60 }
  0xcb   : > { %681 = vmatprep.mubr.f32.mxu1 %v3138_v0 }
  0xcd   : > { %2679 = vmatmul.mubr.msk.f32.gmra.mrb[18].mxu0 %vm407_vm0, %v2667_v61 }
  0xce   : > { %1581 = vmatprep.mubr.f32.mxu0 %v3138_v0 }
  0xd1   : > { %2680 = vmatmul.mubr.msk.f32.gmra.mrb[20].mxu0 %vm407_vm0, %v2668_v62 }
  0xd2   : > { %1587 = vmatprep.mubr.f32.mxu0 %v3138_v0 }
  0xd5   : > { %2681 = vmatmul.mubr.msk.f32.gmra.mrb[22].mxu0 %vm407_vm0, %v2669_v63  ;;  %v386_v63 = vld [vmem:[%s4004_s3 + $0x20] sm:$0xff] }
  0xd6   : > { %1755 = vmatprep.mubr.f32.mxu0 %v3138_v0 }
 0x10c   : > { %v3085_v1 = vpop.permute.xlu1 %3084 }
 0x10d   : > { %v3087_v2 = vunpack.i.h.bf16 %v3085_v1  ;;  %v3086_v3 = vunpack.i.l.bf16 %v3085_v1  ;;  %v3080_v4 = vpop.permute.xlu0 %3079  ;;  %v2685_v1 = vld [vmem:[%s4004_s3 + $0x258] sm:$0xff] }
 0x10e   : > { %v3082_v5 = vunpack.i.h.bf16 %v3080_v4  ;;  %v3081_v7 = vunpack.i.l.bf16 %v3080_v4  ;;  %v387_v4 = vld [vmem:[%s4004_s3 + $0x28] sm:$0xff] }
 0x110   : > { %v368_v9 = vsel %vm364_vm10, %v3087_v2, %v3082_v5  ;;  %v367_v10 = vsel %vm364_vm10, %v3086_v3, %v3081_v7  ;;  %v365_v11 = vsel %vm364_vm10, %v3081_v7, %v3086_v3  ;;  %v366_v12 = vsel %vm364_vm10, %v3082_v5, %v3087_v2  ;;  %v2272_v2 = vld [vmem:[%s4005_s4] sm:$0xff]  ;;  %v2273_v3 = vld [vmem:[%s4005_s4 + $0x8] sm:$0xff] }
 0x111   : > { %v2766_v13 = vpack.c.bf16 %v368_v9, %v367_v10  ;;  %v2764_v14 = vpack.c.bf16 %v366_v12, %v365_v11  ;;  %v2686_v5 = vld [vmem:[%s4004_s3 + $0x260] sm:$0xff]  ;;  %v3145_v7 = vmov 0   ;;  %v2274_v9 = vld [vmem:[%s4005_s4 + $0x10] sm:$0xff]  ;;  %v2275_v10 = vld [vmem:[%s4005_s4 + $0x18] sm:$0xff] }
 0x112   : > { %v3095_v15 = vpop.permute.xlu1 %3094  ;;  %v3090_v16 = vpop.permute.xlu0 %3089  ;;  %3128 = vset.pattern.permute.xlu0 %v3145_v7  ;;  %3129 = vset.pattern.permute.xlu1 %v3145_v7  ;;  %v388_v11 = vld [vmem:[%s4004_s3 + $0x30] sm:$0xff]  ;;  %v2687_v12 = vld [vmem:[%s4004_s3 + $0x268] sm:$0xff] }
 0x113   : > { %v3097_v17 = vunpack.i.h.bf16 %v3095_v15  ;;  %v3096_v18 = vunpack.i.l.bf16 %v3095_v15  ;;  %v3092_v19 = vunpack.i.h.bf16 %v3090_v16  ;;  %v3091_v20 = vunpack.i.l.bf16 %v3090_v16  ;;  %2765 = vmatprep.subr.bf16.mxu1 %v2764_v14  ;;  %2286 = vperm.xlu0 %3128, %v2272_v2   ;;  %v2277_v14 = vld [vmem:[%s4005_s4 + $0x28] sm:$0xff]  ;;  %v389_v15 = vld [vmem:[%s4004_s3 + $0x38] sm:$0xff]  ;;  %v2688_v16 = vld [vmem:[%s4004_s3 + $0x270] sm:$0xff] }
 0x114   : > { %2767 = vmatpush1.bf16.msra.mxu1 %v2766_v13  ;;  %2291 = vperm.xlu1 %3129, %v2273_v3   ;;  %v2276_v13 = vld [vmem:[%s4005_s4 + $0x20] sm:$0xff]  ;;  %v2613_v2 = vld [vmem:[%s4004_s3 + $0x138] sm:$0xff]  ;;  %v2732_v3 = vld [vmem:[%s4004_s3 + $0x310] sm:$0xff] }
 0x115   : > { %v1629_v25 = vsel %vm364_vm10, %v3097_v17, %v3092_v19  ;;  %v1628_v26 = vsel %vm364_vm10, %v3096_v18, %v3091_v20  ;;  %v1626_v29 = vsel %vm364_vm10, %v3091_v20, %v3096_v18  ;;  %v1627_v30 = vsel %vm364_vm10, %v3092_v19, %v3097_v17  ;;  %v2278_v17 = vld [vmem:[%s4005_s4 + $0x30] sm:$0xff]  ;;  %v2279_v18 = vld [vmem:[%s4005_s4 + $0x38] sm:$0xff]  ;;  %v390_v19 = vld [vmem:[%s4004_s3 + $0x40] sm:$0xff] }
 0x116   : > { %v2786_v31 = vpack.c.bf16 %v1629_v25, %v1628_v26  ;;  %v3105_v32 = vpop.permute.xlu1 %3104  ;;  %v3100_v33 = vpop.permute.xlu0 %3099  ;;  %v2784_v34 = vpack.c.bf16 %v1627_v30, %v1626_v29  ;;  %v2689_v20 = vld [vmem:[%s4004_s3 + $0x278] sm:$0xff]  ;;  %v2280_v25 = vld [vmem:[%s4005_s4 + $0x40] sm:$0xff]  ;;  %v2281_v26 = vld [vmem:[%s4005_s4 + $0x48] sm:$0xff] }
 0x117   : > { %v3107_v37 = vunpack.i.h.bf16 %v3105_v32  ;;  %v3106_v38 = vunpack.i.l.bf16 %v3105_v32  ;;  %v3102_v39 = vunpack.i.h.bf16 %v3100_v33  ;;  %v3101_v40 = vunpack.i.l.bf16 %v3100_v33  ;;  %2574 = vmatmul.mubr.msk.f32.vlgmr.msra.gmra.mrb[0].mxu1 %vm407_vm0, %v382_v27  ;;  %2301 = vperm.xlu0 %3128, %v2275_v10   ;;  %v391_v27 = vld [vmem:[%s4004_s3 + $0x48] sm:$0xff]  ;;  %v2690_v29 = vld [vmem:[%s4004_s3 + $0x280] sm:$0xff]  ;;  %v2282_v30 = vld [vmem:[%s4005_s4 + $0x50] sm:$0xff] }
 0x118   : > { %2785 = vmatprep.subr.bf16.mxu0 %v2784_v34  ;;  %687 = vmatprep.mubr.f32.mxu1 %v3138_v0  ;;  %v392_v32 = vld [vmem:[%s4004_s3 + $0x50] sm:$0xff]  ;;  %v2691_v33 = vld [vmem:[%s4004_s3 + $0x288] sm:$0xff]  ;;  %v393_v34 = vld [vmem:[%s4004_s3 + $0x58] sm:$0xff] }
 0x119   : > { %v379_v41 = vsel %vm377_vm9, %v3102_v39, %v3107_v37  ;;  %v378_v42 = vsel %vm377_vm9, %v3101_v40, %v3106_v38  ;;  %2787 = vmatpush1.bf16.msra.mxu0 %v2786_v31  ;;  %v380_v44 = vsel %vm377_vm9, %v3106_v38, %v3101_v40  ;;  %v381_v8 = vsel %vm377_vm9, %v3107_v37, %v3102_v39  ;;  %v2283_v31 = vld [vmem:[%s4005_s4 + $0x58] sm:$0xff]  ;;  %v2692_v37 = vld [vmem:[%s4004_s3 + $0x290] sm:$0xff]  ;;  %v2586_v40 = vld [vmem:[%s4004_s3 + $0xc0] sm:$0xff] }
 0x11a   : > { %v2770_v46 = vpack.c.bf16 %v379_v41, %v378_v42  ;;  %v3526_v47 = vpop.permute.xlu1 %3114  ;;  %v3528_v6 = vpop.permute.xlu0 %3109  ;;  %2789 = vmatprep.subr.bf16.mxu0 %v2788_v35  ;;  %v2768_v52 = vpack.c.bf16 %v381_v8, %v380_v44  ;;  %2296 = vperm.xlu1 %3129, %v2274_v9   ;;  %v2693_v41 = vld [vmem:[%s4004_s3 + $0x298] sm:$0xff]  ;;  %v2615_v7 = vld [vmem:[%s4004_s3 + $0x148] sm:$0xff]  ;;  %v2734_v9 = vld [vmem:[%s4004_s3 + $0x320] sm:$0xff] }
 0x11b   : > { %v3117_v48 = vunpack.i.h.bf16 %v3526_v47  ;;  %v3116_v49 = vunpack.i.l.bf16 %v3526_v47  ;;  %v3112_v50 = vunpack.i.h.bf16 %v3528_v6  ;;  %v3111_v51 = vunpack.i.l.bf16 %v3528_v6  ;;  %2575 = vmatmul.mubr.msk.f32.gmra.mrb[2].mxu1 %vm407_vm0, %v383_v43  ;;  %2311 = vperm.xlu0 %3128, %v2277_v14   ;;  %v2707_v6 = vld [vmem:[%s4004_s3 + $0x2a8] sm:$0xff]  ;;  %v2589_v8 = vld [vmem:[%s4004_s3 + $0xd8] sm:$0xff]  ;;  %v2616_v10 = vld [vmem:[%s4004_s3 + $0x150] sm:$0xff] }
 0x11c   : > { %2694 = vmatmul.mubr.msk.f32.vlgmr.msra.gmra.mrb[0].mxu0 %vm407_vm0, %v2682_v45  ;;  %693 = vmatprep.mubr.f32.mxu1 %v3138_v0  ;;  %v2587_v45 = vld [vmem:[%s4004_s3 + $0xc8] sm:$0xff]  ;;  %v2618_v14 = vld [vmem:[%s4004_s3 + $0x160] sm:$0xff] }
 0x11d   : > { %2791 = vmatpush1.bf16.msra.mxu0 %v2790_v36  ;;  %v972_v35 = vsel %vm364_vm10, %v3111_v51, %v3116_v49  ;;  %2769 = vmatprep.subr.bf16.mxu1 %v2768_v52  ;;  %v973_v23 = vsel %vm364_vm10, %v3112_v50, %v3117_v48  ;;  %v975_v38 = vsel %vm364_vm10, %v3117_v48, %v3112_v50  ;;  %v2708_v48 = vld [vmem:[%s4004_s3 + $0x2b0] sm:$0xff]  ;;  %v2709_v50 = vld [vmem:[%s4004_s3 + $0x2b8] sm:$0xff]  ;;  %v2710_v52 = vld [vmem:[%s4004_s3 + $0x2c0] sm:$0xff] }
 0x11e   : > { %v3557_v53 = vpop.permute.xlu1 %3124  ;;  %v3559_v54 = vpop.permute.xlu0 %3119  ;;  %1761 = vmatprep.mubr.f32.mxu0 %v3138_v0  ;;  %2771 = vmatpush1.bf16.msra.mxu1 %v2770_v46  ;;  %v2772_v57 = vpack.c.bf16 %v973_v23, %v972_v35  ;;  %v974_v39 = vsel %vm364_vm10, %v3116_v49, %v3111_v51  ;;  %v2706_v46 = vld [vmem:[%s4004_s3 + $0x2a0] sm:$0xff]  ;;  %v2591_v51 = vld [vmem:[%s4004_s3 + $0xe8] sm:$0xff]  ;;  %v2593_v35 = vld [vmem:[%s4004_s3 + $0xf8] sm:$0xff] }
 0x11f   : > { %v3127_v24 = vunpack.i.h.bf16 %v3557_v53  ;;  %v3126_v36 = vunpack.i.l.bf16 %v3557_v53  ;;  %v3122_v55 = vunpack.i.h.bf16 %v3559_v54  ;;  %v3121_v56 = vunpack.i.l.bf16 %v3559_v54  ;;  %2576 = vmatmul.mubr.msk.f32.gmra.mrb[4].mxu1 %vm407_vm0, %v384_v21  ;;  %2306 = vperm.xlu1 %3129, %v2276_v13   ;;  %v2590_v49 = vld [vmem:[%s4004_s3 + $0xe0] sm:$0xff]  ;;  %v2592_v21 = vld [vmem:[%s4004_s3 + $0xf0] sm:$0xff]  ;;  %v2713_v23 = vld [vmem:[%s4004_s3 + $0x2d8] sm:$0xff] }
 0x120   : > { %2695 = vmatmul.mubr.msk.f32.gmra.mrb[2].mxu0 %vm407_vm0, %v2683_v22  ;;  %699 = vmatprep.mubr.f32.mxu1 %v3138_v0  ;;  %v2774_v42 = vpack.c.bf16 %v975_v38, %v974_v39  ;;  %v2711_v22 = vld [vmem:[%s4004_s3 + $0x2c8] sm:$0xff]  ;;  %v2712_v53 = vld [vmem:[%s4004_s3 + $0x2d0] sm:$0xff]  ;;  %v2594_v54 = vld [vmem:[%s4004_s3 + $0x100] sm:$0xff] }
 0x121   : > { %1767 = vmatprep.mubr.f32.mxu0 %v3138_v0  ;;  %v1640_v60 = vsel %vm377_vm9, %v3126_v36, %v3121_v56  ;;  %v1641_v61 = vsel %vm377_vm9, %v3127_v24, %v3122_v55  ;;  %2773 = vmatprep.subr.bf16.mxu1 %v2772_v57  ;;  %v1639_v43 = vsel %vm377_vm9, %v3122_v55, %v3127_v24  ;;  %v2595_v24 = vld [vmem:[%s4004_s3 + $0x108] sm:$0xff]  ;;  %v2596_v55 = vld [vmem:[%s4004_s3 + $0x110] sm:$0xff]  ;;  %v2597_v57 = vld [vmem:[%s4004_s3 + $0x118] sm:$0xff] }
 0x122   : > { %v2792_v62 = vpack.c.bf16 %v1641_v61, %v1640_v60  ;;  %2321 = vperm.xlu0 %3128, %v2279_v18   ;;  %v1638_v44 = vsel %vm377_vm9, %v3121_v56, %v3126_v36  ;;  %v2714_v36 = vld [vmem:[%s4004_s3 + $0x2e0] sm:$0xff]  ;;  %v2715_v56 = vld [vmem:[%s4004_s3 + $0x2e8] sm:$0xff]  ;;  %v2717_v60 = vld [vmem:[%s4004_s3 + $0x2f8] sm:$0xff] }
 0x123   : > { %2577 = vmatmul.mubr.msk.f32.gmra.mrb[6].mxu1 %vm407_vm0, %v385_v58  ;;  %2316 = vperm.xlu1 %3129, %v2278_v17   ;;  %v2794_v47 = vpack.c.bf16 %v1639_v43, %v1638_v44  ;;  %v2716_v58 = vld [vmem:[%s4004_s3 + $0x2f0] sm:$0xff]  ;;  %v2611_v61 = vld [vmem:[%s4004_s3 + $0x128] sm:$0xff]  ;;  %v2738_v17 = vld [vmem:[%s4004_s3 + $0x340] sm:$0xff] }
 0x124   : > { %2696 = vmatmul.mubr.msk.f32.gmra.mrb[4].mxu0 %vm407_vm0, %v2684_v59  ;;  %705 = vmatprep.mubr.f32.mxu1 %v3138_v0  ;;  %v2610_v59 = vld [vmem:[%s4004_s3 + $0x120] sm:$0xff]  ;;  %v2736_v13 = vld [vmem:[%s4004_s3 + $0x330] sm:$0xff] }
 0x125   : > { %2793 = vmatprep.subr.bf16.mxu0 %v2792_v62  ;;  %1773 = vmatprep.mubr.f32.mxu0 %v3138_v0  ;;  %v2730_v62 = vld [vmem:[%s4004_s3 + $0x300] sm:$0xff]  ;;  %v2620_v18 = vld [vmem:[%s4004_s3 + $0x170] sm:$0xff] }
 0x126   : > { %2331 = vperm.xlu0 %3128, %v2281_v26   ;;  %v2741_v26 = vld [vmem:[%s4004_s3 + $0x358] sm:$0xff] }
 0x127   : > { %2578 = vmatmul.mubr.msk.f32.gmra.mrb[8].mxu1 %vm407_vm0, %v386_v63  ;;  %2326 = vperm.xlu1 %3129, %v2280_v25   ;;  %v2612_v63 = vld [vmem:[%s4004_s3 + $0x130] sm:$0xff] }
 0x128   : > { %2697 = vmatmul.mubr.msk.f32.gmra.mrb[6].mxu0 %vm407_vm0, %v2685_v1  ;;  %711 = vmatprep.mubr.f32.mxu1 %v3138_v0  ;;  %v2731_v1 = vld [vmem:[%s4004_s3 + $0x308] sm:$0xff]  ;;  %v2740_v25 = vld [vmem:[%s4004_s3 + $0x350] sm:$0xff] }
 0x129   : > { %1779 = vmatprep.mubr.f32.mxu0 %v3138_v0 }
 0x12a   : > { %2341 = vperm.xlu0 %3128, %v2283_v31  }
 0x12b   : > { %2579 = vmatmul.mubr.msk.f32.gmra.mrb[10].mxu1 %vm407_vm0, %v387_v4  ;;  %2336 = vperm.xlu1 %3129, %v2282_v30   ;;  %v2614_v4 = vld [vmem:[%s4004_s3 + $0x140] sm:$0xff] }
 0x12c   : > { %2698 = vmatmul.mubr.msk.f32.gmra.mrb[8].mxu0 %vm407_vm0, %v2686_v5  ;;  %717 = vmatprep.mubr.f32.mxu1 %v3138_v0  ;;  %v2733_v5 = vld [vmem:[%s4004_s3 + $0x318] sm:$0xff] }
 0x12d   : > { %1785 = vmatprep.mubr.f32.mxu0 %v3138_v0 }
 0x12f   : > { %2580 = vmatmul.mubr.msk.f32.gmra.mrb[12].mxu1 %vm407_vm0, %v388_v11  ;;  %v2735_v11 = vld [vmem:[%s4004_s3 + $0x328] sm:$0xff] }
 0x130   : > { %2699 = vmatmul.mubr.msk.f32.gmra.mrb[10].mxu0 %vm407_vm0, %v2687_v12  ;;  %723 = vmatprep.mubr.f32.mxu1 %v3138_v0  ;;  %v2617_v12 = vld [vmem:[%s4004_s3 + $0x158] sm:$0xff] }
 0x131   : > { %1791 = vmatprep.mubr.f32.mxu0 %v3138_v0 }
 0x133   : > { %2581 = vmatmul.mubr.msk.f32.gmra.mrb[14].mxu1 %vm407_vm0, %v389_v15  ;;  %v2737_v15 = vld [vmem:[%s4004_s3 + $0x338] sm:$0xff] }
 0x134   : > { %2700 = vmatmul.mubr.msk.f32.gmra.mrb[12].mxu0 %vm407_vm0, %v2688_v16  ;;  %729 = vmatprep.mubr.f32.mxu1 %v3138_v0  ;;  %v2619_v16 = vld [vmem:[%s4004_s3 + $0x168] sm:$0xff] }
 0x135   : > { %1797 = vmatprep.mubr.f32.mxu0 %v3138_v0 }
 0x137   : > { %2582 = vmatmul.mubr.msk.f32.gmra.mrb[16].mxu1 %vm407_vm0, %v390_v19  ;;  %v2739_v19 = vld [vmem:[%s4004_s3 + $0x348] sm:$0xff] }
 0x138   : > { %2701 = vmatmul.mubr.msk.f32.gmra.mrb[14].mxu0 %vm407_vm0, %v2689_v20  ;;  %735 = vmatprep.mubr.f32.mxu1 %v3138_v0  ;;  %v2621_v20 = vld [vmem:[%s4004_s3 + $0x178] sm:$0xff] }
 0x139   : > { %1803 = vmatprep.mubr.f32.mxu0 %v3138_v0 }
 0x13b   : > { %2583 = vmatmul.mubr.msk.f32.gmra.mrb[18].mxu1 %vm407_vm0, %v391_v27 }
 0x13c   : > { %2702 = vmatmul.mubr.msk.f32.gmra.mrb[16].mxu0 %vm407_vm0, %v2690_v29  ;;  %741 = vmatprep.mubr.f32.mxu1 %v3138_v0 }
 0x13d   : > { %1809 = vmatprep.mubr.f32.mxu0 %v3138_v0 }
 0x13f   : > { %2584 = vmatmul.mubr.msk.f32.gmra.mrb[20].mxu1 %vm407_vm0, %v392_v32 }
 0x140   : > { %2703 = vmatmul.mubr.msk.f32.gmra.mrb[18].mxu0 %vm407_vm0, %v2691_v33  ;;  %747 = vmatprep.mubr.f32.mxu1 %v3138_v0 }
 0x141   : > { %1815 = vmatprep.mubr.f32.mxu0 %v3138_v0 }
 0x143   : > { %2585 = vmatmul.mubr.msk.f32.gmra.mrb[22].mxu1 %vm407_vm0, %v393_v34 }
 0x144   : > { %2704 = vmatmul.mubr.msk.f32.gmra.mrb[20].mxu0 %vm407_vm0, %v2692_v37  ;;  %867 = vmatprep.mubr.f32.mxu1 %v3138_v0 }
 0x145   : > { %1821 = vmatprep.mubr.f32.mxu0 %v3138_v0 }
 0x147   : > { %2598 = vmatmul.mubr.msk.f32.vlgmr.msra.gmra.mrb[0].mxu1 %vm407_vm0, %v2586_v40 }
 0x148   : > { %2705 = vmatmul.mubr.msk.f32.gmra.mrb[22].mxu0 %vm407_vm0, %v2693_v41  ;;  %873 = vmatprep.mubr.f32.mxu1 %v3138_v0 }
 0x149   : > { %1965 = vmatprep.mubr.f32.mxu0 %v3138_v0  ;;  %2775 = vmatpush1.bf16.msra.mxu1 %v2774_v42 }
 0x14b   : > { %2599 = vmatmul.mubr.msk.f32.gmra.mrb[2].mxu1 %vm407_vm0, %v2587_v45 }
 0x14c   : > { %2718 = vmatmul.mubr.msk.f32.vlgmr.msra.gmra.mrb[0].mxu0 %vm407_vm0, %v2706_v46  ;;  %879 = vmatprep.mubr.f32.mxu1 %v3138_v0 }
 0x14d   : > { %2795 = vmatpush1.bf16.msra.mxu0 %v2794_v47  ;;  %1971 = vmatprep.mubr.f32.mxu0 %v3138_v0 }
 0x14f   : > { %2600 = vmatmul.mubr.msk.f32.gmra.mrb[4].mxu1 %vm407_vm0, %v2588_v28 }
 0x150   : > { %2719 = vmatmul.mubr.msk.f32.gmra.mrb[2].mxu0 %vm407_vm0, %v2707_v6  ;;  %885 = vmatprep.mubr.f32.mxu1 %v3138_v0 }
 0x151   : > { %1977 = vmatprep.mubr.f32.mxu0 %v3138_v0 }
 0x153   : > { %2601 = vmatmul.mubr.msk.f32.gmra.mrb[6].mxu1 %vm407_vm0, %v2589_v8 }
 0x154   : > { %2720 = vmatmul.mubr.msk.f32.gmra.mrb[4].mxu0 %vm407_vm0, %v2708_v48  ;;  %891 = vmatprep.mubr.f32.mxu1 %v3138_v0 }
 0x155   : > { %1983 = vmatprep.mubr.f32.mxu0 %v3138_v0 }
 0x157   : > { %2602 = vmatmul.mubr.msk.f32.gmra.mrb[8].mxu1 %vm407_vm0, %v2590_v49 }
 0x158   : > { %2721 = vmatmul.mubr.msk.f32.gmra.mrb[6].mxu0 %vm407_vm0, %v2709_v50  ;;  %897 = vmatprep.mubr.f32.mxu1 %v3138_v0 }
 0x159   : > { %1989 = vmatprep.mubr.f32.mxu0 %v3138_v0 }
 0x15b   : > { %2603 = vmatmul.mubr.msk.f32.gmra.mrb[10].mxu1 %vm407_vm0, %v2591_v51 }
 0x15c   : > { %2722 = vmatmul.mubr.msk.f32.gmra.mrb[8].mxu0 %vm407_vm0, %v2710_v52  ;;  %903 = vmatprep.mubr.f32.mxu1 %v3138_v0 }
 0x15d   : > { %1995 = vmatprep.mubr.f32.mxu0 %v3138_v0 }
 0x15f   : > { %2604 = vmatmul.mubr.msk.f32.gmra.mrb[12].mxu1 %vm407_vm0, %v2592_v21 }
 0x160   : > { %2723 = vmatmul.mubr.msk.f32.gmra.mrb[10].mxu0 %vm407_vm0, %v2711_v22  ;;  %909 = vmatprep.mubr.f32.mxu1 %v3138_v0 }
 0x161   : > { %2001 = vmatprep.mubr.f32.mxu0 %v3138_v0 }
 0x163   : > { %2605 = vmatmul.mubr.msk.f32.gmra.mrb[14].mxu1 %vm407_vm0, %v2593_v35 }
 0x164   : > { %2724 = vmatmul.mubr.msk.f32.gmra.mrb[12].mxu0 %vm407_vm0, %v2712_v53  ;;  %915 = vmatprep.mubr.f32.mxu1 %v3138_v0 }
 0x165   : > { %2007 = vmatprep.mubr.f32.mxu0 %v3138_v0 }
 0x167   : > { %2606 = vmatmul.mubr.msk.f32.gmra.mrb[16].mxu1 %vm407_vm0, %v2594_v54 }
 0x168   : > { %2725 = vmatmul.mubr.msk.f32.gmra.mrb[14].mxu0 %vm407_vm0, %v2713_v23  ;;  %921 = vmatprep.mubr.f32.mxu1 %v3138_v0 }
 0x169   : > { %2013 = vmatprep.mubr.f32.mxu0 %v3138_v0 }
 0x16b   : > { %2607 = vmatmul.mubr.msk.f32.gmra.mrb[18].mxu1 %vm407_vm0, %v2595_v24 }
 0x16c   : > { %2726 = vmatmul.mubr.msk.f32.gmra.mrb[16].mxu0 %vm407_vm0, %v2714_v36  ;;  %927 = vmatprep.mubr.f32.mxu1 %v3138_v0 }
 0x16d   : > { %2019 = vmatprep.mubr.f32.mxu0 %v3138_v0 }
 0x16f   : > { %2608 = vmatmul.mubr.msk.f32.gmra.mrb[20].mxu1 %vm407_vm0, %v2596_v55 }
 0x170   : > { %2727 = vmatmul.mubr.msk.f32.gmra.mrb[18].mxu0 %vm407_vm0, %v2715_v56  ;;  %933 = vmatprep.mubr.f32.mxu1 %v3138_v0 }
 0x171   : > { %2025 = vmatprep.mubr.f32.mxu0 %v3138_v0 }
 0x173   : > { %2609 = vmatmul.mubr.msk.f32.gmra.mrb[22].mxu1 %vm407_vm0, %v2597_v57 }
 0x174   : > { %2728 = vmatmul.mubr.msk.f32.gmra.mrb[20].mxu0 %vm407_vm0, %v2716_v58  ;;  %1101 = vmatprep.mubr.f32.mxu1 %v3138_v0 }
 0x175   : > { %2031 = vmatprep.mubr.f32.mxu0 %v3138_v0 }
 0x177   : > { %2622 = vmatmul.mubr.msk.f32.vlgmr.msra.gmra.mrb[0].mxu1 %vm407_vm0, %v2610_v59 }
 0x178   : > { %2729 = vmatmul.mubr.msk.f32.gmra.mrb[22].mxu0 %vm407_vm0, %v2717_v60  ;;  %1107 = vmatprep.mubr.f32.mxu1 %v3138_v0 }
 0x179   : > { %2175 = vmatprep.mubr.f32.mxu0 %v3138_v0 }
 0x17b   : > { %2623 = vmatmul.mubr.msk.f32.gmra.mrb[2].mxu1 %vm407_vm0, %v2611_v61 }
 0x17c   : > { %2742 = vmatmul.mubr.msk.f32.vlgmr.msra.gmra.mrb[0].mxu0 %vm407_vm0, %v2730_v62  ;;  %1113 = vmatprep.mubr.f32.mxu1 %v3138_v0 }
 0x17d   : > { %2181 = vmatprep.mubr.f32.mxu0 %v3138_v0 }
 0x17f   : > { %2624 = vmatmul.mubr.msk.f32.gmra.mrb[4].mxu1 %vm407_vm0, %v2612_v63 }
 0x180   : > { %2743 = vmatmul.mubr.msk.f32.gmra.mrb[2].mxu0 %vm407_vm0, %v2731_v1  ;;  %1119 = vmatprep.mubr.f32.mxu1 %v3138_v0 }
 0x181   : > { %2187 = vmatprep.mubr.f32.mxu0 %v3138_v0 }
 0x183   : > { %2625 = vmatmul.mubr.msk.f32.gmra.mrb[6].mxu1 %vm407_vm0, %v2613_v2 }
 0x184   : > { %2744 = vmatmul.mubr.msk.f32.gmra.mrb[4].mxu0 %vm407_vm0, %v2732_v3  ;;  %1125 = vmatprep.mubr.f32.mxu1 %v3138_v0 }
 0x185   : > { %2193 = vmatprep.mubr.f32.mxu0 %v3138_v0 }
 0x187   : > { %2626 = vmatmul.mubr.msk.f32.gmra.mrb[8].mxu1 %vm407_vm0, %v2614_v4 }
 0x188   : > { %2745 = vmatmul.mubr.msk.f32.gmra.mrb[6].mxu0 %vm407_vm0, %v2733_v5  ;;  %1131 = vmatprep.mubr.f32.mxu1 %v3138_v0 }
 0x189   : > { %2199 = vmatprep.mubr.f32.mxu0 %v3138_v0 }
 0x18b   : > { %2627 = vmatmul.mubr.msk.f32.gmra.mrb[10].mxu1 %vm407_vm0, %v2615_v7 }
 0x18c   : > { %2746 = vmatmul.mubr.msk.f32.gmra.mrb[8].mxu0 %vm407_vm0, %v2734_v9  ;;  %1137 = vmatprep.mubr.f32.mxu1 %v3138_v0 }
 0x18d   : > { %2205 = vmatprep.mubr.f32.mxu0 %v3138_v0 }
 0x18f   : > { %2628 = vmatmul.mubr.msk.f32.gmra.mrb[12].mxu1 %vm407_vm0, %v2616_v10 }
 0x190   : > { %2747 = vmatmul.mubr.msk.f32.gmra.mrb[10].mxu0 %vm407_vm0, %v2735_v11  ;;  %1143 = vmatprep.mubr.f32.mxu1 %v3138_v0 }
 0x191   : > { %2211 = vmatprep.mubr.f32.mxu0 %v3138_v0 }
 0x192   : > { %v2287_v38 = vpop.permute.xlu0 %2286 }
 0x193   : > { %2629 = vmatmul.mubr.msk.f32.gmra.mrb[14].mxu1 %vm407_vm0, %v2617_v12  ;;  %v2292_v39 = vpop.permute.xlu1 %2291 }
 0x194   : > { %2748 = vmatmul.mubr.msk.f32.gmra.mrb[12].mxu0 %vm407_vm0, %v2736_v13  ;;  %1149 = vmatprep.mubr.f32.mxu1 %v3138_v0 }
 0x195   : > { %2217 = vmatprep.mubr.f32.mxu0 %v3138_v0 }
 0x196   : > { %v2302_v62 = vpop.permute.xlu0 %2301 }
 0x197   : > { %2630 = vmatmul.mubr.msk.f32.gmra.mrb[16].mxu1 %vm407_vm0, %v2618_v14 }
 0x198   : > { %2749 = vmatmul.mubr.msk.f32.gmra.mrb[14].mxu0 %vm407_vm0, %v2737_v15  ;;  %1155 = vmatprep.mubr.f32.mxu1 %v3138_v0 }
 0x199   : > { %2223 = vmatprep.mubr.f32.mxu0 %v3138_v0  ;;  %v2297_v54 = vpop.permute.xlu1 %2296 }
 0x19b   : > { %2631 = vmatmul.mubr.msk.f32.gmra.mrb[18].mxu1 %vm407_vm0, %v2619_v16 }
 0x19c   : > { %2750 = vmatmul.mubr.msk.f32.gmra.mrb[16].mxu0 %vm407_vm0, %v2738_v17  ;;  %1161 = vmatprep.mubr.f32.mxu1 %v3138_v0 }
 0x19d   : > { %2229 = vmatprep.mubr.f32.mxu0 %v3138_v0 }
 0x19e   : > { %v2307_v15 = vpop.permute.xlu1 %2306 }
 0x19f   : > { %2632 = vmatmul.mubr.msk.f32.gmra.mrb[20].mxu1 %vm407_vm0, %v2620_v18 }
 0x1a0   : > { %2751 = vmatmul.mubr.msk.f32.gmra.mrb[18].mxu0 %vm407_vm0, %v2739_v19  ;;  %1167 = vmatprep.mubr.f32.mxu1 %v3138_v0 }
 0x1a1   : > { %2235 = vmatprep.mubr.f32.mxu0 %v3138_v0 }
 0x1a3   : > { %2633 = vmatmul.mubr.msk.f32.gmra.mrb[22].mxu1 %vm407_vm0, %v2621_v20 }
 0x1a4   : > { %2752 = vmatmul.mubr.msk.f32.gmra.mrb[20].mxu0 %vm407_vm0, %v2740_v25  ;;  %2469 = vmatprep.mubr.f32.mxu1 %v3138_v0 }
 0x1a5   : > { %2241 = vmatprep.mubr.f32.mxu0 %v3138_v0 }
 0x1a8   : > { %2753 = vmatmul.mubr.msk.f32.gmra.mrb[22].mxu0 %vm407_vm0, %v2741_v26 }
 0x24a   : > { %v1103_v27 = vpop.f32.mrb[0].mxu1 }
 0x24b   : > { %v1105_v29 = vpop.f32.mrb[1].mxu1 }
 0x24e   : > { %v1109_v30 = vpop.f32.mrb[2].mxu1 }
 0x24f   : > { %v2177_v31 = vpop.f32.mrb[0].mxu0  ;;  %v1111_v32 = vpop.f32.mrb[3].mxu1 }
 0x250   : > { %v2820_v33 = vadd.f32 %v2177_v31, %v1103_v27  ;;  %v2179_v34 = vpop.f32.mrb[1].mxu0 }
 0x251   : > { %v2821_v37 = vadd.f32 %v2179_v34, %v1105_v29 }
 0x252   : > { %v1115_v40 = vpop.f32.mrb[4].mxu1  ;;  %v2344_v43 = vadd.f32 %v2820_v33, %v2287_v38 }
 0x253   : > { %v2183_v41 = vpop.f32.mrb[2].mxu0  ;;  %v1117_v42 = vpop.f32.mrb[5].mxu1  ;;  %v2345_v46 = vadd.f32 %v2821_v37, %v2287_v38 }
 0x254   : > { %v2822_v44 = vadd.f32 %v2183_v41, %v1109_v30  ;;  %v2185_v45 = vpop.f32.mrb[3].mxu0  ;;  %v2368_v49 = vmax.f32 %v2344_v43, 0.0  ;;  %v2312_v30 = vpop.permute.xlu0 %2311 }
 0x255   : > { %v2823_v47 = vadd.f32 %v2185_v45, %v1111_v32  ;;  %v2369_v22 = vmax.f32 %v2345_v46, 0.0  ;;  %v2317_v46 = vpop.permute.xlu1 %2316 }
 0x256   : > { %v2346_v28 = vadd.f32 %v2822_v44, %v2292_v39  ;;  %v1121_v6 = vpop.f32.mrb[6].mxu1 }
 0x257   : > { %v2347_v8 = vadd.f32 %v2823_v47, %v2292_v39  ;;  %v2189_v48 = vpop.f32.mrb[4].mxu0  ;;  %v1123_v50 = vpop.f32.mrb[7].mxu1 }
 0x258   : > { %v2370_v51 = vmax.f32 %v2346_v28, 0.0  ;;  %v2824_v52 = vadd.f32 %v2189_v48, %v1115_v40  ;;  %v2191_v21 = vpop.f32.mrb[5].mxu0 }
 0x259   : > { %v2371_v35 = vmax.f32 %v2347_v8, 0.0  ;;  %v2825_v53 = vadd.f32 %v2191_v21, %v1117_v42  ;;  %v2322_v21 = vpop.permute.xlu0 %2321 }
 0x25a   : > { %v2798_v23 = vpack.c.bf16 %v2370_v51, %v2368_v49  ;;  %v1127_v24 = vpop.f32.mrb[8].mxu1  ;;  %v2348_v57 = vadd.f32 %v2824_v52, %v2297_v54 }
 0x25b   : > { %v2195_v36 = vpop.f32.mrb[6].mxu0  ;;  %v2796_v55 = vpack.c.bf16 %v2371_v35, %v2369_v22  ;;  %v1129_v56 = vpop.f32.mrb[9].mxu1  ;;  %v2349_v60 = vadd.f32 %v2825_v53, %v2297_v54 }
 0x25c   : > { %v2826_v58 = vadd.f32 %v2195_v36, %v1121_v6  ;;  %v2197_v59 = vpop.f32.mrb[7].mxu0  ;;  %v2372_v4 = vmax.f32 %v2348_v57, 0.0 }
 0x25d   : > { %v2827_v61 = vadd.f32 %v2197_v59, %v1123_v50  ;;  %2797 = vmatprep.subr.bf16.mxu1 %v2796_v55  ;;  %v2373_v11 = vmax.f32 %v2349_v60, 0.0 }
 0x25e   : > { %v2350_v63 = vadd.f32 %v2826_v58, %v2302_v62  ;;  %2799 = vmatpush1.bf16.msra.mxu1 %v2798_v23  ;;  %v1133_v1 = vpop.f32.mrb[10].mxu1 }
 0x25f   : > { %v2351_v2 = vadd.f32 %v2827_v61, %v2302_v62  ;;  %v2201_v3 = vpop.f32.mrb[8].mxu0  ;;  %v1135_v5 = vpop.f32.mrb[11].mxu1 }
 0x260   : > { %v2374_v7 = vmax.f32 %v2350_v63, 0.0  ;;  %v2828_v9 = vadd.f32 %v2201_v3, %v1127_v24  ;;  %v2203_v10 = vpop.f32.mrb[9].mxu0  ;;  %v2327_v61 = vpop.permute.xlu1 %2326 }
 0x261   : > { %v2375_v12 = vmax.f32 %v2351_v2, 0.0  ;;  %v2829_v13 = vadd.f32 %v2203_v10, %v1129_v56  ;;  %v2332_v10 = vpop.permute.xlu0 %2331 }
 0x262   : > { %v2802_v14 = vpack.c.bf16 %v2374_v7, %v2372_v4  ;;  %v1139_v16 = vpop.f32.mrb[12].mxu1  ;;  %v2352_v20 = vadd.f32 %v2828_v9, %v2307_v15 }
 0x263   : > { %v2207_v17 = vpop.f32.mrb[10].mxu0  ;;  %v2800_v18 = vpack.c.bf16 %v2375_v12, %v2373_v11  ;;  %v1141_v19 = vpop.f32.mrb[13].mxu1  ;;  %v2353_v27 = vadd.f32 %v2829_v13, %v2307_v15 }
 0x264   : > { %v2830_v25 = vadd.f32 %v2207_v17, %v1133_v1  ;;  %v2209_v26 = vpop.f32.mrb[11].mxu0  ;;  %v2376_v37 = vmax.f32 %v2352_v20, 0.0 }
 0x265   : > { %v2831_v29 = vadd.f32 %v2209_v26, %v1135_v5  ;;  %2801 = vmatprep.subr.bf16.mxu1 %v2800_v18  ;;  %v2377_v42 = vmax.f32 %v2353_v27, 0.0 }
 0x266   : > { %v2354_v31 = vadd.f32 %v2830_v25, %v2312_v30  ;;  %2803 = vmatpush1.bf16.msra.mxu1 %v2802_v14  ;;  %v1145_v32 = vpop.f32.mrb[14].mxu1 }
 0x267   : > { %v2355_v33 = vadd.f32 %v2831_v29, %v2312_v30  ;;  %v2213_v34 = vpop.f32.mrb[12].mxu0  ;;  %v1147_v38 = vpop.f32.mrb[15].mxu1 }
 0x268   : > { %v2378_v39 = vmax.f32 %v2354_v31, 0.0  ;;  %v2832_v40 = vadd.f32 %v2213_v34, %v1139_v16  ;;  %v2215_v41 = vpop.f32.mrb[13].mxu0  ;;  %v2337_v29 = vpop.permute.xlu1 %2336 }
 0x269   : > { %v2379_v43 = vmax.f32 %v2355_v33, 0.0  ;;  %v2833_v44 = vadd.f32 %v2215_v41, %v1141_v19 }
 0x26a   : > { %v2806_v45 = vpack.c.bf16 %v2378_v39, %v2376_v37  ;;  %v1151_v47 = vpop.f32.mrb[16].mxu1  ;;  %v2356_v48 = vadd.f32 %v2832_v40, %v2317_v46  ;;  %v2342_v39 = vpop.permute.xlu0 %2341 }
 0x26b   : > { %v2219_v28 = vpop.f32.mrb[14].mxu0  ;;  %v2804_v6 = vpack.c.bf16 %v2379_v43, %v2377_v42  ;;  %v1153_v8 = vpop.f32.mrb[17].mxu1  ;;  %v2357_v51 = vadd.f32 %v2833_v44, %v2317_v46 }
 0x26c   : > { %v2834_v49 = vadd.f32 %v2219_v28, %v1145_v32  ;;  %v2221_v50 = vpop.f32.mrb[15].mxu0  ;;  %v2380_v23 = vmax.f32 %v2356_v48, 0.0  ;;  %v2392_v28 = vld [vmem:[%s4006_s5] sm:$0xff]  ;;  %v2395_v48 = vld [vmem:[%s3201_s26 + $0x8] sm:$0xff] }
 0x26d   : > { %v2835_v52 = vadd.f32 %v2221_v50, %v1147_v38  ;;  %2805 = vmatprep.subr.bf16.mxu1 %v2804_v6  ;;  %v2381_v57 = vmax.f32 %v2357_v51, 0.0  ;;  %v2393_v6 = vld [vmem:[%s4006_s5 + $0x8] sm:$0xf] }
 0x26e   : > { %v2358_v22 = vadd.f32 %v2834_v49, %v2322_v21  ;;  %2807 = vmatpush1.bf16.msra.mxu1 %v2806_v45  ;;  %v1157_v35 = vpop.f32.mrb[18].mxu1 }
 0x26f   : > { %v2359_v53 = vadd.f32 %v2835_v52, %v2322_v21  ;;  %v2225_v54 = vpop.f32.mrb[16].mxu0  ;;  %v1159_v24 = vpop.f32.mrb[19].mxu1  ;;  %v2396_v21 = vld [vmem:[%s3201_s26 + $0x10] sm:$0xf] }
 0x270   : > { %v2382_v36 = vmax.f32 %v2358_v22, 0.0  ;;  %v2836_v55 = vadd.f32 %v2225_v54, %v1151_v47  ;;  %v2227_v56 = vpop.f32.mrb[17].mxu0  ;;  %v2397_v22 = vld [vmem:[%s3201_s26 + $0x18] sm:$0xf] }
 0x271   : > { %v2383_v58 = vmax.f32 %v2359_v53, 0.0  ;;  %v2837_v59 = vadd.f32 %v2227_v56, %v1153_v8  ;;  %v2394_v8 = vld [vmem:[%s3201_s26] sm:$0xff] }
 0x272   : > { %v2810_v60 = vpack.c.bf16 %v2382_v36, %v2380_v23  ;;  %v1163_v62 = vpop.f32.mrb[20].mxu1  ;;  %v2360_v3 = vadd.f32 %v2836_v55, %v2327_v61 }
 0x273   : > { %v2231_v63 = vpop.f32.mrb[18].mxu0  ;;  %v2808_v1 = vpack.c.bf16 %v2383_v58, %v2381_v57  ;;  %v1165_v2 = vpop.f32.mrb[21].mxu1  ;;  %v2361_v7 = vadd.f32 %v2837_v59, %v2327_v61 }
 0x274   : > { %v2838_v4 = vadd.f32 %v2231_v63, %v1157_v35  ;;  %v2233_v5 = vpop.f32.mrb[19].mxu0  ;;  %v2384_v15 = vmax.f32 %v2360_v3, 0.0 }
 0x275   : > { %v2839_v9 = vadd.f32 %v2233_v5, %v1159_v24  ;;  %2809 = vmatprep.subr.bf16.mxu1 %v2808_v1  ;;  %v2385_v20 = vmax.f32 %v2361_v7, 0.0 }
 0x276   : > { %v2362_v11 = vadd.f32 %v2838_v4, %v2332_v10  ;;  %2811 = vmatpush1.bf16.msra.mxu1 %v2810_v60  ;;  %v1169_v12 = vpop.f32.mrb[22].mxu1 }
 0x277   : > { %v2363_v13 = vadd.f32 %v2839_v9, %v2332_v10  ;;  %v2237_v14 = vpop.f32.mrb[20].mxu0  ;;  %v1171_v16 = vpop.f32.mrb[23].mxu1 }
 0x278   : > { %v2386_v17 = vmax.f32 %v2362_v11, 0.0  ;;  %v2840_v18 = vadd.f32 %v2237_v14, %v1163_v62  ;;  %v2239_v19 = vpop.f32.mrb[21].mxu0 }
 0x279   : > { %v2387_v25 = vmax.f32 %v2363_v13, 0.0  ;;  %v2841_v26 = vadd.f32 %v2239_v19, %v1165_v2 }
 0x27a   : > { %v2814_v27 = vpack.c.bf16 %v2386_v17, %v2384_v15  ;;  %v2364_v32 = vadd.f32 %v2840_v18, %v2337_v29 }
 0x27b   : > { %v2243_v30 = vpop.f32.mrb[22].mxu0  ;;  %v2812_v31 = vpack.c.bf16 %v2387_v25, %v2385_v20  ;;  %v2365_v37 = vadd.f32 %v2841_v26, %v2337_v29 }
 0x27c   : > { %v2842_v33 = vadd.f32 %v2243_v30, %v1169_v12  ;;  %v2245_v34 = vpop.f32.mrb[23].mxu0  ;;  %v2388_v42 = vmax.f32 %v2364_v32, 0.0 }
 0x27d   : > { %v2843_v38 = vadd.f32 %v2245_v34, %v1171_v16  ;;  %2813 = vmatprep.subr.bf16.mxu1 %v2812_v31  ;;  %v2389_v44 = vmax.f32 %v2365_v37, 0.0 }
 0x27e   : > { %v2366_v40 = vadd.f32 %v2842_v33, %v2342_v39  ;;  %2815 = vmatpush1.bf16.msra.mxu1 %v2814_v27 }
 0x27f   : > { %v2367_v41 = vadd.f32 %v2843_v38, %v2342_v39 }
 0x280   : > { %v2390_v43 = vmax.f32 %v2366_v40, 0.0 }
 0x281   : > { %v2391_v45 = vmax.f32 %v2367_v41, 0.0 }
 0x282   : > { %v2818_v46 = vpack.c.bf16 %v2390_v43, %v2388_v42 }
 0x283   : > { %v2816_v47 = vpack.c.bf16 %v2391_v45, %v2389_v44 }
 0x285   : > { %2817 = vmatprep.subr.bf16.mxu1 %v2816_v47 }
 0x286   : > { %2819 = vmatpush1.bf16.msra.mxu1 %v2818_v46 }
 0x289   : > { %2754 = vmatmul.mubr.msk.f32.vlgmr.msra.gmra.mrb[24].mxu1 %vm2398_vm11, %v2392_v28 }
 0x28a   : > { %2475 = vmatprep.mubr.f32.mxu1 %v3138_v0 }
 0x28d   : > { %2755 = vmatmul.mubr.msk.f32.gmra.mrb[26].mxu1 %vm2398_vm11, %v2393_v6 }
 0x35c   : > { %v2471_v49 = vpop.f32.mrb[24].mxu1 }
 0x35d   : > { %v2472_v50 = vadd.f32 %v2471_v49, %v2394_v8  ;;  %v2473_v51 = vpop.f32.mrb[25].mxu1 }
 0x35e   : > { %v2474_v52 = vadd.f32 %v2473_v51, %v2395_v48 }
 0x35f   : > { %2482 = vst [vmem:[%s251_s20] sm:$0xff] %v2472_v50 }
 0x360   : > { %2483 = vst [vmem:[%s251_s20 + $0x8] sm:$0xff] %v2474_v52  ;;  %v2477_v0 = vpop.f32.mrb[26].mxu1 }
 0x361   : > { %v2478_v35 = vadd.f32 %v2477_v0, %v2396_v21  ;;  %v2479_v53 = vpop.f32.mrb[27].mxu1 }
 0x362   : > { %v2480_v54 = vadd.f32 %v2479_v53, %v2397_v22 }
 0x363   : > { %2484 = vst [vmem:[%s251_s20 + $0x10] sm:$0xf] %v2478_v35 }
 0x364   : > { %2485 = vst [vmem:[%s251_s20 + $0x18] sm:$0xf] %v2480_v54 }
 0x365 PF: > { %s16_s21 = sadd.s32 1, %s3136_s21  }
 0x366   : > { %p13_p4 = scmp.ge.s32.totalorder %s16_s21, 4  }
 0x368   :  { %15 = sbr.rel (!%p13_p4) target bundleno = 1 (0x1), region = 82 }

</bundles_post_ra>
